<compile_context>
chip_gen: v7x
topology: tpu7x:2x2x1
jax: 0.10.0
libtpu: 0.0.40
codegen_flags: <defaults>
</compile_context>

<pallas_src>
import jax
import jax.numpy as jnp
from jax import lax
from jax.experimental import pallas as pl
from jax.experimental.pallas import tpu as pltpu


def _leaky_relu(v, slope=0.2):
    # Identical to where(v >= 0, v, slope*v) for 0 < slope < 1, one op cheaper.
    return jnp.maximum(v, slope * v)


def mine_kernel(x_ref, y_ref, w1x_ref, w1y_ref, b1_ref, w2_ref, b2_ref,
                w3_ref, b3_ref, o_ref):
    contract_last = (((1,), (1,)), ((), ()))  # A @ B^T (contract last dims)

    # Layer 1: (H, V1)·(tb, V1)^T + (H, V2)·(tb, V2)^T -> (H, tb), f32 acc.
    h = lax.dot_general(w1x_ref[...], x_ref[...], contract_last,
                        preferred_element_type=jnp.float32)
    h = h + lax.dot_general(w1y_ref[...], y_ref[...], contract_last,
                            preferred_element_type=jnp.float32)
    h = _leaky_relu(h + b1_ref[...])

    # Layer 2: (H, H) @ (H, tb) -> (H, tb)
    h2 = jnp.dot(w2_ref[...], h, preferred_element_type=jnp.float32)
    h2 = _leaky_relu(h2 + b2_ref[...])

    # Layer 3.
    if o_ref.shape[0] == 1:
        # OC == 1: VPU broadcast-multiply + XLU sublane reduction instead of
        # a <1%-utilized MXU pass.  w3_ref is passed as (H, 1).
        out = jnp.sum(w3_ref[...] * h2, axis=0, keepdims=True)
    else:
        # General OC: (OC, H) @ (H, tb) -> (OC, tb) on the MXU.
        out = jnp.dot(w3_ref[...], h2, preferred_element_type=jnp.float32)
    o_ref[...] = (out + b3_ref[...]).astype(o_ref.dtype)


def _round_up(a, m):
    return (a + m - 1) // m * m


def _tensorcores_per_chip():
    """2 TensorCores (megacore) on v4/v5p/v7x, 1 on v5e/v6e."""
    try:
        kind = jax.devices()[0].device_kind.lower()
    except Exception:
        return 1
    if "v7" in kind or "v4" in kind or "v5p" in kind:
        return 2
    return 1


def _choose_batch_tile(B, tb_req, num_tc, max_tb=2048):
    """Pick the batch tile (multiple of 128).  Never shrinks a requested tb to
    a divisor; defaults give few, large, balanced steps."""
    b128 = _round_up(B, 128)
    if tb_req is not None:
        return min(max(128, (tb_req // 128) * 128), b128)
    if num_tc <= 1 or b128 <= 128:
        # Single TensorCore: grid parallelism buys nothing -> whole (padded)
        # batch per step, up to max_tb, to amortize the ~0.35us/step overhead.
        return min(b128, max_tb)
    # Multi-TC (v7x): even number of equally sized steps (>= 2) so both
    # TensorCores get balanced work, with tiles as large as max_tb allows.
    steps = 2
    tb = _round_up(pl.cdiv(b128, steps), 128)
    while tb > max_tb:
        steps += 2
        tb = _round_up(pl.cdiv(b128, steps), 128)
    return tb


def mine_forward(x, y, params, *, tb=None):
    """params use torch-native layouts:
       w1x [H,V1], w1y [H,V2], b1 [H], w2 [H,H], b2 [H], w3 [OC,H], b3 [OC]."""
    B, V1 = x.shape
    By, V2 = y.shape
    assert B == By, "x and y must share the batch dimension"
    H = params["w1x"].shape[0]
    OC = params["w3"].shape[0]

    num_tc = _tensorcores_per_chip()
    tb_eff = _choose_batch_tile(B, tb, num_tc)
    grid = (pl.cdiv(B, tb_eff),)

    # Only tiny parameter reshapes happen host-side; x and y go in untouched.
    f32 = jnp.float32
    w1x = params["w1x"].astype(f32)                   # (H, V1)
    w1y = params["w1y"].astype(f32)                   # (H, V2)
    w2 = params["w2"].astype(f32)                     # (H, H)
    b1 = params["b1"].reshape(H, 1).astype(f32)
    b2 = params["b2"].reshape(H, 1).astype(f32)
    b3 = params["b3"].reshape(OC, 1).astype(f32)
    if OC == 1:
        w3 = params["w3"].reshape(H, 1).astype(f32)   # column for VPU/XLU path
    else:
        w3 = params["w3"].astype(f32)                 # (OC, H) for MXU path

    # Advisory cost + explicit VMEM budget (large headroom on all chips).
    flops = 2 * B * H * (V1 + V2 + H + OC)
    bytes_accessed = 4 * (B * (V1 + V2 + OC) + H * (V1 + V2 + H + OC) + 2 * H + OC)
    cost = pl.CostEstimate(flops=flops, transcendentals=0,
                           bytes_accessed=bytes_accessed)
    w_bytes = 4 * (H * (V1 + V2 + H + OC) + 2 * H + OC)
    io_bytes = 4 * tb_eff * (V1 + V2 + OC)
    act_bytes = 4 * 2 * H * tb_eff
    vmem_limit = int(min(max(4 * (2 * io_bytes + 2 * w_bytes + act_bytes),
                             8 << 20), 32 << 20))

    in_map = lambda i: (i, 0)     # batch tiles of x / y
    const_map = lambda i: (0, 0)  # weights / biases replicated across tiles
    out_map = lambda i: (0, i)

    def build(single_buffer_weights):
        pm = ({"pipeline_mode": pl.Buffered(buffer_count=1)}
              if single_buffer_weights else {})
        const = lambda shape: pl.BlockSpec(shape, const_map, **pm)
        return pl.pallas_call(
            mine_kernel,
            out_shape=jax.ShapeDtypeStruct((OC, B), x.dtype),
            grid_spec=pltpu.PrefetchScalarGridSpec(
                num_scalar_prefetch=0,
                grid=grid,
                in_specs=[
                    pl.BlockSpec((tb_eff, V1), in_map),   # x tile (batch-major)
                    pl.BlockSpec((tb_eff, V2), in_map),   # y tile (batch-major)
                    const((H, V1)),                        # W1x
                    const((H, V2)),                        # W1y
                    const((H, 1)),                         # fc1 bias
                    const((H, H)),                         # W2
                    const((H, 1)),                         # b2
                    const(w3.shape),                       # W3 (layout per OC)
                    const((OC, 1)),                        # b3
                ],
                out_specs=pl.BlockSpec((OC, tb_eff), out_map),
            ),
            compiler_params=pltpu.CompilerParams(
                dimension_semantics=("parallel",),
                vmem_limit_bytes=vmem_limit),
            cost_estimate=cost,
        )

    args = (x, y, w1x, w1y, b1, w2, b2, w3, b3)
    try:
        # Constant-index blocks fetched once -> single-buffer them to free
        # VMEM headroom (matters for production-sized H on v7x's 64 MiB).
        out_t = build(True)(*args)
    except Exception:
        # Fallback if this Pallas build rejects pipeline_mode=Buffered(1).
        out_t = build(False)(*args)

    # (OC, B) -> (B, OC).  For OC == 1 this is a pure metadata reshape.
    if OC == 1:
        return out_t.reshape(B, OC)
    return out_t.T


def init_params(key, var1_size, var2_size, hidden, oc, dtype=jnp.float32):
    """Deterministic synthetic init, torch-native [out, in] weight layouts."""
    ks = jax.random.split(key, 6)

    def u(k, shape, fan_in):
        bound = float(fan_in) ** -0.5
        return jax.random.uniform(k, shape, dtype, -bound, bound)

    return {
        "w1x": u(ks[0], (hidden, var1_size), var1_size),
        "w1y": u(ks[1], (hidden, var2_size), var2_size),
        "b1": jnp.zeros((hidden,), dtype),   # nn.Parameter(torch.zeros(hidden))
        "w2": u(ks[2], (hidden, hidden), hidden),
        "b2": u(ks[3], (hidden,), hidden),
        "w3": u(ks[4], (oc, hidden), hidden),
        "b3": u(ks[5], (oc,), hidden),
    }


def mine_reference(x, y, p):
    """Pure-f32 JAX reference (exact PyTorch semantics)."""
    with jax.default_matmul_precision("highest"):
        h = _leaky_relu(x @ p["w1x"].T + y @ p["w1y"].T + p["b1"])
        h = _leaky_relu(h @ p["w2"].T + p["b2"])
        return h @ p["w3"].T + p["b3"]


if __name__ == "__main__":
    key = jax.random.PRNGKey(0)
    # Batch large enough for 2 balanced 256-row tiles on v7x (1 big tile on
    # single-TC chips).
    B, V1, V2, H, OC = 512, 16, 24, 32, 1

    k_x, k_y, k_p = jax.random.split(key, 3)
    x = jax.random.normal(k_x, (B, V1), jnp.float32)
    y = jax.random.normal(k_y, (B, V2), jnp.float32)
    params = init_params(k_p, V1, V2, H, OC)

    out = mine_forward(x, y, params)
    out = jax.block_until_ready(out)
    assert out.shape == (B, OC)

    # f32 end-to-end -> tight agreement with the f32 PyTorch-equivalent ref.
    ref = mine_reference(x, y, params)
    assert jnp.allclose(out, ref, atol=1e-3, rtol=1e-3), \
        f"mismatch vs f32 reference (max abs err {float(jnp.max(jnp.abs(out - ref)))})"

    # TODO(synk): self.ma_et in the PyTorch module is optimizer-side moving
    # average state, not part of forward(); nothing to translate.
    print("KERNEL_OK")
</pallas_src>

<mosaic_0001>
module attributes {stable_mosaic.version = 11 : i64} {
  func.func @mine_kernel(%arg0: i32, %arg1: memref<512x16xf32, #tpu.memory_space<vmem>>, %arg2: memref<512x24xf32, #tpu.memory_space<vmem>>, %arg3: memref<32x16xf32, #tpu.memory_space<vmem>>, %arg4: memref<32x24xf32, #tpu.memory_space<vmem>>, %arg5: memref<32x1xf32, #tpu.memory_space<vmem>>, %arg6: memref<32x32xf32, #tpu.memory_space<vmem>>, %arg7: memref<32x1xf32, #tpu.memory_space<vmem>>, %arg8: memref<32x1xf32, #tpu.memory_space<vmem>>, %arg9: memref<1x1xf32, #tpu.memory_space<vmem>>, %arg10: memref<1x512xf32, #tpu.memory_space<vmem>>) attributes {dimension_semantics = [#tpu.dimension_semantics<parallel>], iteration_bounds = array<i64: 1>, scalar_prefetch = 0 : i64, scratch_operands = 0 : i64, tpu.core_type = #tpu.core_type<tc>, window_params = [{transform_indices = @transform_0, window_bounds = array<i64: 512, 16>}, {transform_indices = @transform_1, window_bounds = array<i64: 512, 24>}, {pipeline_mode = #tpu.pipeline_mode<synchronous>, transform_indices = @transform_2, window_bounds = array<i64: 32, 16>}, {pipeline_mode = #tpu.pipeline_mode<synchronous>, transform_indices = @transform_3, window_bounds = array<i64: 32, 24>}, {pipeline_mode = #tpu.pipeline_mode<synchronous>, transform_indices = @transform_4, window_bounds = array<i64: 32, 1>}, {pipeline_mode = #tpu.pipeline_mode<synchronous>, transform_indices = @transform_5, window_bounds = array<i64: 32, 32>}, {pipeline_mode = #tpu.pipeline_mode<synchronous>, transform_indices = @transform_6, window_bounds = array<i64: 32, 1>}, {pipeline_mode = #tpu.pipeline_mode<synchronous>, transform_indices = @transform_7, window_bounds = array<i64: 32, 1>}, {pipeline_mode = #tpu.pipeline_mode<synchronous>, transform_indices = @transform_8, window_bounds = array<i64: 1, 1>}, {transform_indices = @transform_9, window_bounds = array<i64: 1, 512>}]} {
    %c0 = arith.constant 0 : index
    %c0_0 = arith.constant 0 : index
    %0 = vector.load %arg3[%c0, %c0_0] : memref<32x16xf32, #tpu.memory_space<vmem>>, vector<32x16xf32>
    %c0_1 = arith.constant 0 : index
    %c0_2 = arith.constant 0 : index
    %1 = vector.load %arg1[%c0_1, %c0_2] : memref<512x16xf32, #tpu.memory_space<vmem>>, vector<512x16xf32>
    %cst = arith.constant dense<0.000000e+00> : vector<32x512xf32>
    %2 = tpu.matmul %0, %1, %cst {dimension_numbers = #tpu.dot_dimension_numbers<[1], [1], [0], [0], [0, 0, 1, 0], [], []>} : vector<32x16xf32>, vector<512x16xf32>, vector<32x512xf32> -> vector<32x512xf32>
    %c0_3 = arith.constant 0 : index
    %c0_4 = arith.constant 0 : index
    %3 = vector.load %arg4[%c0_3, %c0_4] : memref<32x24xf32, #tpu.memory_space<vmem>>, vector<32x24xf32>
    %c0_5 = arith.constant 0 : index
    %c0_6 = arith.constant 0 : index
    %4 = vector.load %arg2[%c0_5, %c0_6] : memref<512x24xf32, #tpu.memory_space<vmem>>, vector<512x24xf32>
    %cst_7 = arith.constant dense<0.000000e+00> : vector<32x512xf32>
    %5 = tpu.matmul %3, %4, %cst_7 {dimension_numbers = #tpu.dot_dimension_numbers<[1], [1], [0], [0], [0, 0, 1, 0], [], []>} : vector<32x24xf32>, vector<512x24xf32>, vector<32x512xf32> -> vector<32x512xf32>
    %6 = arith.addf %2, %5 : vector<32x512xf32>
    %c0_8 = arith.constant 0 : index
    %c0_9 = arith.constant 0 : index
    %7 = vector.load %arg5[%c0_8, %c0_9] : memref<32x1xf32, #tpu.memory_space<vmem>>, vector<32x1xf32>
    %8 = vector.broadcast %7 : vector<32x1xf32> to vector<32x512xf32>
    %9 = arith.addf %6, %8 : vector<32x512xf32>
    %cst_10 = arith.constant 2.000000e-01 : f32
    %10 = vector.broadcast %cst_10 : f32 to vector<32x512xf32>
    %11 = arith.mulf %10, %9 : vector<32x512xf32>
    %12 = arith.maximumf %9, %11 : vector<32x512xf32>
    %c0_11 = arith.constant 0 : index
    %c0_12 = arith.constant 0 : index
    %13 = vector.load %arg6[%c0_11, %c0_12] : memref<32x32xf32, #tpu.memory_space<vmem>>, vector<32x32xf32>
    %cst_13 = arith.constant dense<0.000000e+00> : vector<32x512xf32>
    %14 = tpu.matmul %13, %12, %cst_13 {dimension_numbers = #tpu.dot_dimension_numbers<[1], [0], [0], [1], [0, 0, 1, 1], [], []>} : vector<32x32xf32>, vector<32x512xf32>, vector<32x512xf32> -> vector<32x512xf32>
    %c0_14 = arith.constant 0 : index
    %c0_15 = arith.constant 0 : index
    %15 = vector.load %arg7[%c0_14, %c0_15] : memref<32x1xf32, #tpu.memory_space<vmem>>, vector<32x1xf32>
    %16 = vector.broadcast %15 : vector<32x1xf32> to vector<32x512xf32>
    %17 = arith.addf %14, %16 : vector<32x512xf32>
    %cst_16 = arith.constant 2.000000e-01 : f32
    %18 = vector.broadcast %cst_16 : f32 to vector<32x512xf32>
    %19 = arith.mulf %18, %17 : vector<32x512xf32>
    %20 = arith.maximumf %17, %19 : vector<32x512xf32>
    %c0_17 = arith.constant 0 : index
    %c0_18 = arith.constant 0 : index
    %21 = vector.load %arg8[%c0_17, %c0_18] : memref<32x1xf32, #tpu.memory_space<vmem>>, vector<32x1xf32>
    %22 = vector.broadcast %21 : vector<32x1xf32> to vector<32x512xf32>
    %23 = arith.mulf %22, %20 : vector<32x512xf32>
    %cst_19 = arith.constant dense<0.000000e+00> : vector<512xf32>
    %24 = vector.multi_reduction <add>, %23, %cst_19 [0] : vector<32x512xf32> to vector<512xf32>
    %25 = vector.shape_cast %24 : vector<512xf32> to vector<1x512xf32>
    %c0_20 = arith.constant 0 : index
    %c0_21 = arith.constant 0 : index
    %26 = vector.load %arg9[%c0_20, %c0_21] : memref<1x1xf32, #tpu.memory_space<vmem>>, vector<1x1xf32>
    %27 = vector.broadcast %26 : vector<1x1xf32> to vector<1x512xf32>
    %28 = arith.addf %25, %27 : vector<1x512xf32>
    %c0_22 = arith.constant 0 : index
    %c0_23 = arith.constant 0 : index
    %29 = vector.load %arg10[%c0_22, %c0_23] : memref<1x512xf32, #tpu.memory_space<vmem>>, vector<1x512xf32>
    tpu.vector_store %arg10[%c0_22, %c0_23], %28 {strides = array<i32>} : memref<1x512xf32, #tpu.memory_space<vmem>>, vector<1x512xf32>,
    return
  }
  func.func @transform_0(%arg0: i32) -> (i32, i32) {
    %c0_i32 = arith.constant 0 : i32
    %c0_i32_0 = arith.constant 0 : i32
    return %arg0, %c0_i32 : i32, i32
  }
  func.func @transform_1(%arg0: i32) -> (i32, i32) {
    %c0_i32 = arith.constant 0 : i32
    %c0_i32_0 = arith.constant 0 : i32
    return %arg0, %c0_i32 : i32, i32
  }
  func.func @transform_2(%arg0: i32) -> (i32, i32) {
    %c0_i32 = arith.constant 0 : i32
    %c0_i32_0 = arith.constant 0 : i32
    %c0_i32_1 = arith.constant 0 : i32
    return %c0_i32, %c0_i32_0 : i32, i32
  }
  func.func @transform_3(%arg0: i32) -> (i32, i32) {
    %c0_i32 = arith.constant 0 : i32
    %c0_i32_0 = arith.constant 0 : i32
    %c0_i32_1 = arith.constant 0 : i32
    return %c0_i32, %c0_i32_0 : i32, i32
  }
  func.func @transform_4(%arg0: i32) -> (i32, i32) {
    %c0_i32 = arith.constant 0 : i32
    %c0_i32_0 = arith.constant 0 : i32
    %c0_i32_1 = arith.constant 0 : i32
    return %c0_i32, %c0_i32_0 : i32, i32
  }
  func.func @transform_5(%arg0: i32) -> (i32, i32) {
    %c0_i32 = arith.constant 0 : i32
    %c0_i32_0 = arith.constant 0 : i32
    %c0_i32_1 = arith.constant 0 : i32
    return %c0_i32, %c0_i32_0 : i32, i32
  }
  func.func @transform_6(%arg0: i32) -> (i32, i32) {
    %c0_i32 = arith.constant 0 : i32
    %c0_i32_0 = arith.constant 0 : i32
    %c0_i32_1 = arith.constant 0 : i32
    return %c0_i32, %c0_i32_0 : i32, i32
  }
  func.func @transform_7(%arg0: i32) -> (i32, i32) {
    %c0_i32 = arith.constant 0 : i32
    %c0_i32_0 = arith.constant 0 : i32
    %c0_i32_1 = arith.constant 0 : i32
    return %c0_i32, %c0_i32_0 : i32, i32
  }
  func.func @transform_8(%arg0: i32) -> (i32, i32) {
    %c0_i32 = arith.constant 0 : i32
    %c0_i32_0 = arith.constant 0 : i32
    %c0_i32_1 = arith.constant 0 : i32
    return %c0_i32, %c0_i32_0 : i32, i32
  }
  func.func @transform_9(%arg0: i32) -> (i32, i32) {
    %c0_i32 = arith.constant 0 : i32
    %c0_i32_0 = arith.constant 0 : i32
    return %c0_i32, %arg0 : i32, i32
  }
}

module attributes {stable_mosaic.version = 11 : i64} {
  func.func @mine_kernel(%arg0: i32, %arg1: memref<512x16xf32, #tpu.memory_space<vmem>>, %arg2: memref<512x24xf32, #tpu.memory_space<vmem>>, %arg3: memref<32x16xf32, #tpu.memory_space<vmem>>, %arg4: memref<32x24xf32, #tpu.memory_space<vmem>>, %arg5: memref<32x1xf32, #tpu.memory_space<vmem>>, %arg6: memref<32x32xf32, #tpu.memory_space<vmem>>, %arg7: memref<32x1xf32, #tpu.memory_space<vmem>>, %arg8: memref<32x1xf32, #tpu.memory_space<vmem>>, %arg9: memref<1x1xf32, #tpu.memory_space<vmem>>, %arg10: memref<1x512xf32, #tpu.memory_space<vmem>>) attributes {dimension_semantics = [#tpu.dimension_semantics<parallel>], iteration_bounds = array<i64: 1>, scalar_prefetch = 0 : i64, scratch_operands = 0 : i64, tpu.core_type = #tpu.core_type<tc>, window_params = [{transform_indices = @transform_0, window_bounds = array<i64: 512, 16>}, {transform_indices = @transform_1, window_bounds = array<i64: 512, 24>}, {pipeline_mode = #tpu.pipeline_mode<synchronous>, transform_indices = @transform_2, window_bounds = array<i64: 32, 16>}, {pipeline_mode = #tpu.pipeline_mode<synchronous>, transform_indices = @transform_3, window_bounds = array<i64: 32, 24>}, {pipeline_mode = #tpu.pipeline_mode<synchronous>, transform_indices = @transform_4, window_bounds = array<i64: 32, 1>}, {pipeline_mode = #tpu.pipeline_mode<synchronous>, transform_indices = @transform_5, window_bounds = array<i64: 32, 32>}, {pipeline_mode = #tpu.pipeline_mode<synchronous>, transform_indices = @transform_6, window_bounds = array<i64: 32, 1>}, {pipeline_mode = #tpu.pipeline_mode<synchronous>, transform_indices = @transform_7, window_bounds = array<i64: 32, 1>}, {pipeline_mode = #tpu.pipeline_mode<synchronous>, transform_indices = @transform_8, window_bounds = array<i64: 1, 1>}, {transform_indices = @transform_9, window_bounds = array<i64: 1, 512>}]} {
    %c0 = arith.constant 0 : index
    %c0_0 = arith.constant 0 : index
    %0 = vector.load %arg3[%c0, %c0_0] : memref<32x16xf32, #tpu.memory_space<vmem>>, vector<32x16xf32>
    %c0_1 = arith.constant 0 : index
    %c0_2 = arith.constant 0 : index
    %1 = vector.load %arg1[%c0_1, %c0_2] : memref<512x16xf32, #tpu.memory_space<vmem>>, vector<512x16xf32>
    %cst = arith.constant dense<0.000000e+00> : vector<32x512xf32>
    %2 = tpu.matmul %0, %1, %cst {dimension_numbers = #tpu.dot_dimension_numbers<[1], [1], [0], [0], [0, 0, 1, 0], [], []>} : vector<32x16xf32>, vector<512x16xf32>, vector<32x512xf32> -> vector<32x512xf32>
    %c0_3 = arith.constant 0 : index
    %c0_4 = arith.constant 0 : index
    %3 = vector.load %arg4[%c0_3, %c0_4] : memref<32x24xf32, #tpu.memory_space<vmem>>, vector<32x24xf32>
    %c0_5 = arith.constant 0 : index
    %c0_6 = arith.constant 0 : index
    %4 = vector.load %arg2[%c0_5, %c0_6] : memref<512x24xf32, #tpu.memory_space<vmem>>, vector<512x24xf32>
    %cst_7 = arith.constant dense<0.000000e+00> : vector<32x512xf32>
    %5 = tpu.matmul %3, %4, %cst_7 {dimension_numbers = #tpu.dot_dimension_numbers<[1], [1], [0], [0], [0, 0, 1, 0], [], []>} : vector<32x24xf32>, vector<512x24xf32>, vector<32x512xf32> -> vector<32x512xf32>
    %6 = arith.addf %2, %5 : vector<32x512xf32>
    %c0_8 = arith.constant 0 : index
    %c0_9 = arith.constant 0 : index
    %7 = vector.load %arg5[%c0_8, %c0_9] : memref<32x1xf32, #tpu.memory_space<vmem>>, vector<32x1xf32>
    %8 = vector.broadcast %7 : vector<32x1xf32> to vector<32x512xf32>
    %9 = arith.addf %6, %8 : vector<32x512xf32>
    %cst_10 = arith.constant 2.000000e-01 : f32
    %10 = vector.broadcast %cst_10 : f32 to vector<32x512xf32>
    %11 = arith.mulf %10, %9 : vector<32x512xf32>
    %12 = arith.maximumf %9, %11 : vector<32x512xf32>
    %c0_11 = arith.constant 0 : index
    %c0_12 = arith.constant 0 : index
    %13 = vector.load %arg6[%c0_11, %c0_12] : memref<32x32xf32, #tpu.memory_space<vmem>>, vector<32x32xf32>
    %cst_13 = arith.constant dense<0.000000e+00> : vector<32x512xf32>
    %14 = tpu.matmul %13, %12, %cst_13 {dimension_numbers = #tpu.dot_dimension_numbers<[1], [0], [0], [1], [0, 0, 1, 1], [], []>} : vector<32x32xf32>, vector<32x512xf32>, vector<32x512xf32> -> vector<32x512xf32>
    %c0_14 = arith.constant 0 : index
    %c0_15 = arith.constant 0 : index
    %15 = vector.load %arg7[%c0_14, %c0_15] : memref<32x1xf32, #tpu.memory_space<vmem>>, vector<32x1xf32>
    %16 = vector.broadcast %15 : vector<32x1xf32> to vector<32x512xf32>
    %17 = arith.addf %14, %16 : vector<32x512xf32>
    %cst_16 = arith.constant 2.000000e-01 : f32
    %18 = vector.broadcast %cst_16 : f32 to vector<32x512xf32>
    %19 = arith.mulf %18, %17 : vector<32x512xf32>
    %20 = arith.maximumf %17, %19 : vector<32x512xf32>
    %c0_17 = arith.constant 0 : index
    %c0_18 = arith.constant 0 : index
    %21 = vector.load %arg8[%c0_17, %c0_18] : memref<32x1xf32, #tpu.memory_space<vmem>>, vector<32x1xf32>
    %22 = vector.broadcast %21 : vector<32x1xf32> to vector<32x512xf32>
    %23 = arith.mulf %22, %20 : vector<32x512xf32>
    %cst_19 = arith.constant dense<0.000000e+00> : vector<512xf32>
    %24 = vector.multi_reduction <add>, %23, %cst_19 [0] : vector<32x512xf32> to vector<512xf32>
    %25 = vector.shape_cast %24 : vector<512xf32> to vector<1x512xf32>
    %c0_20 = arith.constant 0 : index
    %c0_21 = arith.constant 0 : index
    %26 = vector.load %arg9[%c0_20, %c0_21] : memref<1x1xf32, #tpu.memory_space<vmem>>, vector<1x1xf32>
    %27 = vector.broadcast %26 : vector<1x1xf32> to vector<1x512xf32>
    %28 = arith.addf %25, %27 : vector<1x512xf32>
    %c0_22 = arith.constant 0 : index
    %c0_23 = arith.constant 0 : index
    %29 = vector.load %arg10[%c0_22, %c0_23] : memref<1x512xf32, #tpu.memory_space<vmem>>, vector<1x512xf32>
    tpu.vector_store %arg10[%c0_22, %c0_23], %28 {strides = array<i32>} : memref<1x512xf32, #tpu.memory_space<vmem>>, vector<1x512xf32>,
    return
  }
  func.func @transform_0(%arg0: i32) -> (i32, i32) {
    %c0_i32 = arith.constant 0 : i32
    %c0_i32_0 = arith.constant 0 : i32
    return %arg0, %c0_i32 : i32, i32
  }
  func.func @transform_1(%arg0: i32) -> (i32, i32) {
    %c0_i32 = arith.constant 0 : i32
    %c0_i32_0 = arith.constant 0 : i32
    return %arg0, %c0_i32 : i32, i32
  }
  func.func @transform_2(%arg0: i32) -> (i32, i32) {
    %c0_i32 = arith.constant 0 : i32
    %c0_i32_0 = arith.constant 0 : i32
    %c0_i32_1 = arith.constant 0 : i32
    return %c0_i32, %c0_i32_0 : i32, i32
  }
  func.func @transform_3(%arg0: i32) -> (i32, i32) {
    %c0_i32 = arith.constant 0 : i32
    %c0_i32_0 = arith.constant 0 : i32
    %c0_i32_1 = arith.constant 0 : i32
    return %c0_i32, %c0_i32_0 : i32, i32
  }
  func.func @transform_4(%arg0: i32) -> (i32, i32) {
    %c0_i32 = arith.constant 0 : i32
    %c0_i32_0 = arith.constant 0 : i32
    %c0_i32_1 = arith.constant 0 : i32
    return %c0_i32, %c0_i32_0 : i32, i32
  }
  func.func @transform_5(%arg0: i32) -> (i32, i32) {
    %c0_i32 = arith.constant 0 : i32
    %c0_i32_0 = arith.constant 0 : i32
    %c0_i32_1 = arith.constant 0 : i32
    return %c0_i32, %c0_i32_0 : i32, i32
  }
  func.func @transform_6(%arg0: i32) -> (i32, i32) {
    %c0_i32 = arith.constant 0 : i32
    %c0_i32_0 = arith.constant 0 : i32
    %c0_i32_1 = arith.constant 0 : i32
    return %c0_i32, %c0_i32_0 : i32, i32
  }
  func.func @transform_7(%arg0: i32) -> (i32, i32) {
    %c0_i32 = arith.constant 0 : i32
    %c0_i32_0 = arith.constant 0 : i32
    %c0_i32_1 = arith.constant 0 : i32
    return %c0_i32, %c0_i32_0 : i32, i32
  }
  func.func @transform_8(%arg0: i32) -> (i32, i32) {
    %c0_i32 = arith.constant 0 : i32
    %c0_i32_0 = arith.constant 0 : i32
    %c0_i32_1 = arith.constant 0 : i32
    return %c0_i32, %c0_i32_0 : i32, i32
  }
  func.func @transform_9(%arg0: i32) -> (i32, i32) {
    %c0_i32 = arith.constant 0 : i32
    %c0_i32_0 = arith.constant 0 : i32
    return %c0_i32, %arg0 : i32, i32
  }
}

</mosaic_0001>

<bundles_post_ra>
// kernel: tpu_custom_call.1
= control target key start
LH: loop header
LB: loop body
LE: loop exit
PB: predicated region body
PF: predicated region fallthrough
CT: control target
= control target key end

     0   :  { %s2695_s0 = inlined_call_operand.vmem [shape: f32[512,16], index: 0, kind: input, shape index: {}]   ;;  %s2696_s1 = inlined_call_operand.vmem [shape: f32[512,24], index: 1, kind: input, shape index: {}]   ;;  %s2697_s2 = inlined_call_operand.vmem [shape: f32[32,16], index: 2, kind: input, shape index: {}]   ;;  %s2698_s3 = inlined_call_operand.vmem [shape: f32[32,24], index: 3, kind: input, shape index: {}]   ;;  %s2699_s4 = inlined_call_operand.vmem [shape: f32[32,1], index: 4, kind: input, shape index: {}]   ;;  %s2700_s5 = inlined_call_operand.vmem [shape: f32[32,32], index: 5, kind: input, shape index: {}]   ;;  %s2701_s6 = inlined_call_operand.vmem [shape: f32[32,1], index: 6, kind: input, shape index: {}]   ;;  %s2702_s7 = inlined_call_operand.vmem [shape: f32[32,1], index: 7, kind: input, shape index: {}]   ;;  %s2703_s8 = inlined_call_operand.<no memory space> [shape: f32[1,1], index: 8, kind: input, shape index: {}]   ;;  %s2704_s9 = inlined_call_operand.hbm [shape: f32[1,512], index: 9, kind: output, shape index: {}]  }
   0x1   :  { %v14_v0 = vstv %s2703_s8 }
   0x2   :  { %15 = vst [vmem:[#allocation2] sm:$0x1] %v14_v0 }
   0x3   :  { %v123_v1 = vld [vmem:[%s2696_s1 + $0x80] sm:$0xff]  ;;  %v124_v2 = vld [vmem:[%s2696_s1 + $0x88] sm:$0xff]  ;;  %vm171_vm0 = vcmask 195584   ;;  %v125_v14 = vld [vmem:[%s2696_s1 + $0x90] sm:$0xff]  ;;  %v1964_v42 = vmov 0  }
   0x4   :  { %v155_v3 = vld [vmem:[%s2696_s1 + $0x180] sm:$0xff]  ;;  %v1710_v4 = vpack.c.bf16 %v124_v2, %v123_v1  ;;  %vm2032_vm1 = vmpackc.low %vm171_vm0, %vm171_vm0  ;;  %v156_v6 = vld [vmem:[%s2696_s1 + $0x188] sm:$0xff]  ;;  %1938 = vset.pattern.permute.xlu0 %v1964_v42  ;;  %1939 = vset.pattern.permute.xlu1 %v1964_v42 }
   0x5   :  { %v107_v7 = vld [vmem:[%s2696_s1] sm:$0xff]  ;;  %v1758_v8 = vpack.c.bf16 %v156_v6, %v155_v3  ;;  %v108_v9 = vld [vmem:[%s2696_s1 + $0x8] sm:$0xff]  ;;  %v126_v15 = vld [vmem:[%s2696_s1 + $0x98] sm:$0xff] }
   0x6   :  { %v139_v10 = vld [vmem:[%s2696_s1 + $0x100] sm:$0xff]  ;;  %v140_v11 = vld [vmem:[%s2696_s1 + $0x108] sm:$0xff]  ;;  %1712 = vmatprep.subr.msk.bf16.mxu0 %vm2032_vm1, %v1710_v4  ;;  %v1713_v12 = vpack.c.bf16 %v108_v9, %v107_v7  ;;  %v157_v16 = vld [vmem:[%s2696_s1 + $0x190] sm:$0xff]  ;;  %v1716_v17 = vpack.c.bf16 %v126_v15, %v125_v14 }
   0x7   :  { %v1761_v13 = vpack.c.bf16 %v140_v11, %v139_v10  ;;  %1760 = vmatprep.subr.msk.bf16.mxu1 %vm2032_vm1, %v1758_v8  ;;  %v158_v18 = vld [vmem:[%s2696_s1 + $0x198] sm:$0xff]  ;;  %v109_v20 = vld [vmem:[%s2696_s1 + $0x10] sm:$0xff]  ;;  %v127_v24 = vld [vmem:[%s2696_s1 + $0xa0] sm:$0xff] }
   0x8   :  { %1715 = vmatpush3.bf16.xpose.msk.msra.mxu0 %vm2032_vm1, %v1713_v12  ;;  %v1764_v19 = vpack.c.bf16 %v158_v18, %v157_v16  ;;  %v110_v21 = vld [vmem:[%s2696_s1 + $0x18] sm:$0xff]  ;;  %v141_v22 = vld [vmem:[%s2696_s1 + $0x110] sm:$0xff]  ;;  %v128_v25 = vld [vmem:[%s2696_s1 + $0xa8] sm:$0xff] }
   0x9   :  { %1763 = vmatpush3.bf16.xpose.msk.msra.mxu1 %vm2032_vm1, %v1761_v13  ;;  %1718 = vmatprep.subr.msk.bf16.mxu0 %vm2032_vm1, %v1716_v17  ;;  %v142_v23 = vld [vmem:[%s2696_s1 + $0x118] sm:$0xff]  ;;  %v159_v26 = vld [vmem:[%s2696_s1 + $0x1a0] sm:$0xff]  ;;  %v160_v27 = vld [vmem:[%s2696_s1 + $0x1a8] sm:$0xff]  ;;  %v1719_v28 = vpack.c.bf16 %v110_v21, %v109_v20  ;;  %v1722_v30 = vpack.c.bf16 %v128_v25, %v127_v24 }
   0xa   :  { %1766 = vmatprep.subr.msk.bf16.mxu1 %vm2032_vm1, %v1764_v19  ;;  %v1767_v29 = vpack.c.bf16 %v142_v23, %v141_v22  ;;  %v1770_v31 = vpack.c.bf16 %v160_v27, %v159_v26  ;;  %v111_v32 = vld [vmem:[%s2696_s1 + $0x20] sm:$0xff]  ;;  %v112_v33 = vld [vmem:[%s2696_s1 + $0x28] sm:$0xff]  ;;  %v129_v36 = vld [vmem:[%s2696_s1 + $0xb0] sm:$0xff] }
   0xb   :  { %v143_v34 = vld [vmem:[%s2696_s1 + $0x120] sm:$0xff]  ;;  %v144_v35 = vld [vmem:[%s2696_s1 + $0x128] sm:$0xff]  ;;  %v130_v37 = vld [vmem:[%s2696_s1 + $0xb8] sm:$0xff]  ;;  %v1725_v40 = vpack.c.bf16 %v112_v33, %v111_v32 }
   0xc   :  { %v161_v38 = vld [vmem:[%s2696_s1 + $0x1b0] sm:$0xff]  ;;  %v162_v39 = vld [vmem:[%s2696_s1 + $0x1b8] sm:$0xff]  ;;  %v1773_v41 = vpack.c.bf16 %v144_v35, %v143_v34  ;;  %v1728_v43 = vpack.c.bf16 %v130_v37, %v129_v36  ;;  %v2144_v47 = vld [vmem:[%s2698_s3] sm:$0xff] }
   0xd   :  { %v1776_v44 = vpack.c.bf16 %v162_v39, %v161_v38  ;;  %v113_v45 = vld [vmem:[%s2696_s1 + $0x30] sm:$0xff]  ;;  %v114_v46 = vld [vmem:[%s2696_s1 + $0x38] sm:$0xff]  ;;  %v131_v50 = vld [vmem:[%s2696_s1 + $0xc0] sm:$0xff]  ;;  %1582 = vmatprep.mubr.msk.f32.mxu0 %vm171_vm0, %v2144_v47  ;;  %1622 = vmatprep.mubr.msk.f32.mxu1 %vm171_vm0, %v2144_v47 }
   0xe   :  { %v145_v48 = vld [vmem:[%s2696_s1 + $0x130] sm:$0xff]  ;;  %v146_v49 = vld [vmem:[%s2696_s1 + $0x138] sm:$0xff]  ;;  %v132_v51 = vld [vmem:[%s2696_s1 + $0xc8] sm:$0xff]  ;;  %v1731_v54 = vpack.c.bf16 %v114_v46, %v113_v45 }
   0xf   :  { %v163_v52 = vld [vmem:[%s2696_s1 + $0x1c0] sm:$0xff]  ;;  %v164_v53 = vld [vmem:[%s2696_s1 + $0x1c8] sm:$0xff]  ;;  %v1779_v55 = vpack.c.bf16 %v146_v49, %v145_v48  ;;  %v1734_v56 = vpack.c.bf16 %v132_v51, %v131_v50  ;;  %v133_v62 = vld [vmem:[%s2696_s1 + $0xd0] sm:$0xff] }
  0x10   :  { %1721 = vmatpush3.bf16.xpose.msk.msra.mxu0 %vm2032_vm1, %v1719_v28  ;;  %v1782_v57 = vpack.c.bf16 %v164_v53, %v163_v52  ;;  %v115_v58 = vld [vmem:[%s2696_s1 + $0x40] sm:$0xff]  ;;  %v116_v59 = vld [vmem:[%s2696_s1 + $0x48] sm:$0xff]  ;;  %v134_v63 = vld [vmem:[%s2696_s1 + $0xd8] sm:$0xff] }
  0x11   :  { %1769 = vmatpush3.bf16.xpose.msk.msra.mxu1 %vm2032_vm1, %v1767_v29  ;;  %1724 = vmatprep.subr.msk.bf16.mxu0 %vm2032_vm1, %v1722_v30  ;;  %v147_v60 = vld [vmem:[%s2696_s1 + $0x140] sm:$0xff]  ;;  %v148_v61 = vld [vmem:[%s2696_s1 + $0x148] sm:$0xff]  ;;  %v165_v0 = vld [vmem:[%s2696_s1 + $0x1d0] sm:$0xff]  ;;  %v1737_v2 = vpack.c.bf16 %v116_v59, %v115_v58  ;;  %v1740_v4 = vpack.c.bf16 %v134_v63, %v133_v62 }
  0x12   :  { %1772 = vmatprep.subr.msk.bf16.mxu1 %vm2032_vm1, %v1770_v31  ;;  %v166_v1 = vld [vmem:[%s2696_s1 + $0x1d8] sm:$0xff]  ;;  %v1785_v3 = vpack.c.bf16 %v148_v61, %v147_v60  ;;  %v117_v7 = vld [vmem:[%s2696_s1 + $0x50] sm:$0xff]  ;;  %v135_v11 = vld [vmem:[%s2696_s1 + $0xe0] sm:$0xff] }
  0x13   :  { %v1788_v6 = vpack.c.bf16 %v166_v1, %v165_v0  ;;  %v118_v8 = vld [vmem:[%s2696_s1 + $0x58] sm:$0xff]  ;;  %v149_v9 = vld [vmem:[%s2696_s1 + $0x150] sm:$0xff]  ;;  %v136_v12 = vld [vmem:[%s2696_s1 + $0xe8] sm:$0xff] }
  0x14   :  { %v150_v10 = vld [vmem:[%s2696_s1 + $0x158] sm:$0xff]  ;;  %v167_v13 = vld [vmem:[%s2696_s1 + $0x1e0] sm:$0xff]  ;;  %v168_v14 = vld [vmem:[%s2696_s1 + $0x1e8] sm:$0xff]  ;;  %v1743_v15 = vpack.c.bf16 %v118_v8, %v117_v7  ;;  %v1746_v17 = vpack.c.bf16 %v136_v12, %v135_v11 }
  0x15   :  { %v1791_v16 = vpack.c.bf16 %v150_v10, %v149_v9  ;;  %v1794_v18 = vpack.c.bf16 %v168_v14, %v167_v13  ;;  %v119_v19 = vld [vmem:[%s2696_s1 + $0x60] sm:$0xff]  ;;  %v120_v20 = vld [vmem:[%s2696_s1 + $0x68] sm:$0xff]  ;;  %v137_v23 = vld [vmem:[%s2696_s1 + $0xf0] sm:$0xff] }
  0x16   :  { %v151_v21 = vld [vmem:[%s2696_s1 + $0x160] sm:$0xff]  ;;  %v152_v22 = vld [vmem:[%s2696_s1 + $0x168] sm:$0xff]  ;;  %v138_v24 = vld [vmem:[%s2696_s1 + $0xf8] sm:$0xff]  ;;  %v1749_v30 = vpack.c.bf16 %v120_v20, %v119_v19 }
  0x17   :  { %v937_v25 = vld [vmem:[%s2699_s4] sm:$0xff]  ;;  %v169_v26 = vld [vmem:[%s2696_s1 + $0x1f0] sm:$0xff]  ;;  %v170_v27 = vld [vmem:[%s2696_s1 + $0x1f8] sm:$0xff]  ;;  %v1797_v31 = vpack.c.bf16 %v152_v22, %v151_v21  ;;  %v1752_v33 = vpack.c.bf16 %v138_v24, %v137_v23 }
  0x18   :  { %1727 = vmatpush3.bf16.xpose.msk.msra.mxu0 %vm2032_vm1, %v1725_v40  ;;  %943 = vperm.xlu0 %1938, %v937_v25   ;;  %v939_v28 = vld [vmem:[%s2699_s4 + $0x10] sm:$0xff]  ;;  %v938_v29 = vld [vmem:[%s2699_s4 + $0x8] sm:$0xff]  ;;  %v940_v32 = vld [vmem:[%s2699_s4 + $0x18] sm:$0xff]  ;;  %v1800_v34 = vpack.c.bf16 %v170_v27, %v169_v26 }
  0x19   :  { %1775 = vmatpush3.bf16.xpose.msk.msra.mxu1 %vm2032_vm1, %v1773_v41  ;;  %1730 = vmatprep.subr.msk.bf16.mxu0 %vm2032_vm1, %v1728_v43 }
  0x1a   :  { %1778 = vmatprep.subr.msk.bf16.mxu1 %vm2032_vm1, %v1776_v44  ;;  %953 = vperm.xlu1 %1939, %v939_v28  }
  0x20   :  { %1733 = vmatpush3.bf16.xpose.msk.msra.mxu0 %vm2032_vm1, %v1731_v54 }
  0x21   :  { %1781 = vmatpush3.bf16.xpose.msk.msra.mxu1 %vm2032_vm1, %v1779_v55  ;;  %1736 = vmatprep.subr.msk.bf16.mxu0 %vm2032_vm1, %v1734_v56 }
  0x22   :  { %1784 = vmatprep.subr.msk.bf16.mxu1 %vm2032_vm1, %v1782_v57 }
  0x28   :  { %1739 = vmatpush3.bf16.xpose.msk.msra.mxu0 %vm2032_vm1, %v1737_v2 }
  0x29   :  { %1787 = vmatpush3.bf16.xpose.msk.msra.mxu1 %vm2032_vm1, %v1785_v3  ;;  %1742 = vmatprep.subr.msk.bf16.mxu0 %vm2032_vm1, %v1740_v4 }
  0x2a   :  { %1790 = vmatprep.subr.msk.bf16.mxu1 %vm2032_vm1, %v1788_v6 }
  0x30   :  { %1745 = vmatpush3.bf16.xpose.msk.msra.mxu0 %vm2032_vm1, %v1743_v15 }
  0x31   :  { %1793 = vmatpush3.bf16.xpose.msk.msra.mxu1 %vm2032_vm1, %v1791_v16  ;;  %1748 = vmatprep.subr.msk.bf16.mxu0 %vm2032_vm1, %v1746_v17 }
  0x32   :  { %1796 = vmatprep.subr.msk.bf16.mxu1 %vm2032_vm1, %v1794_v18 }
  0x33   :  { %16 = vsyncpa [#allocation4], 0  ;;  %948 = vperm.xlu0 %1938, %v938_v29   ;;  %v1013_v35 = vld [vmem:[%s2701_s6] sm:$0xff]  ;;  %958 = vperm.xlu1 %1939, %v940_v32   ;;  %v121_v36 = vld [vmem:[%s2696_s1 + $0x70] sm:$0xff]  ;;  %vm554_vm2 = vcmask 130048   ;;  %vm1037_vm4 = vcmask 261120  }
  0x34   :  { %v122_v37 = vld [vmem:[%s2696_s1 + $0x78] sm:$0xff]  ;;  %v1014_v38 = vld [vmem:[%s2701_s6 + $0x8] sm:$0xff]  ;;  %v153_v39 = vld [vmem:[%s2696_s1 + $0x170] sm:$0xff] }
  0x35   :  { %v154_v40 = vld [vmem:[%s2696_s1 + $0x178] sm:$0xff]  ;;  %v55_v41 = vld [vmem:[%s2695_s0 + $0x80] sm:$0xff]  ;;  %v56_v42 = vld [vmem:[%s2695_s0 + $0x88] sm:$0xff]  ;;  %v1755_v46 = vpack.c.bf16 %v122_v37, %v121_v36 }
  0x36   :  { %v87_v43 = vld [vmem:[%s2695_s0 + $0x180] sm:$0xff]  ;;  %v88_v44 = vld [vmem:[%s2695_s0 + $0x188] sm:$0xff]  ;;  %v1015_v45 = vld [vmem:[%s2701_s6 + $0x10] sm:$0xff]  ;;  %v1803_v48 = vpack.c.bf16 %v154_v40, %v153_v39  ;;  %v1806_v50 = vpack.c.bf16 %v56_v42, %v55_v41 }
  0x37   :  { %1019 = vperm.xlu0 %1938, %v1013_v35   ;;  %1024 = vperm.xlu1 %1939, %v1014_v38   ;;  %v1016_v49 = vld [vmem:[%s2701_s6 + $0x18] sm:$0xff]  ;;  %v1854_v51 = vpack.c.bf16 %v88_v44, %v87_v43  ;;  %vm2326_vm3 = vmpackc.low %vm554_vm2, %vm554_vm2  ;;  %v1260_v53 = vld [vmem:[%s2702_s7] sm:$0xff] }
  0x38   :  { %1751 = vmatpush3.bf16.xpose.msk.msra.mxu0 %vm2032_vm1, %v1749_v30  ;;  %v39_v54 = vld [vmem:[%s2695_s0] sm:$0xff]  ;;  %v40_v55 = vld [vmem:[%s2695_s0 + $0x8] sm:$0xff]  ;;  %v57_v58 = vld [vmem:[%s2695_s0 + $0x90] sm:$0xff] }
  0x39   :  { %1799 = vmatpush3.bf16.xpose.msk.msra.mxu1 %vm2032_vm1, %v1797_v31  ;;  %1754 = vmatprep.subr.msk.bf16.mxu0 %vm2032_vm1, %v1752_v33  ;;  %v1261_v56 = vld [vmem:[%s2702_s7 + $0x8] sm:$0xff]  ;;  %v71_v5 = vld [vmem:[%s2695_s0 + $0x100] sm:$0xff]  ;;  %v58_v59 = vld [vmem:[%s2695_s0 + $0x98] sm:$0xff]  ;;  %v1809_v63 = vpack.c.bf16 %v40_v55, %v39_v54 }
  0x3a   :  { %1802 = vmatprep.subr.msk.bf16.mxu1 %vm2032_vm1, %v1800_v34  ;;  %v72_v57 = vld [vmem:[%s2695_s0 + $0x108] sm:$0xff]  ;;  %v89_v60 = vld [vmem:[%s2695_s0 + $0x190] sm:$0xff]  ;;  %v90_v61 = vld [vmem:[%s2695_s0 + $0x198] sm:$0xff]  ;;  %v1812_v1 = vpack.c.bf16 %v58_v59, %v57_v58 }
  0x3b   :  { %1029 = vperm.xlu0 %1938, %v1015_v45   ;;  %1034 = vperm.xlu1 %1939, %v1016_v49   ;;  %v1262_v62 = vld [vmem:[%s2702_s7 + $0x10] sm:$0xff]  ;;  %v1857_v0 = vpack.c.bf16 %v72_v57, %v71_v5  ;;  %v1860_v2 = vpack.c.bf16 %v90_v61, %v89_v60  ;;  %v42_v4 = vld [vmem:[%s2695_s0 + $0x18] sm:$0xff]  ;;  %v104_v6 = vld [vmem:[%s2698_s3 + $0x8] sm:$0xff] }
  0x3c   :  { %v41_v3 = vld [vmem:[%s2695_s0 + $0x10] sm:$0xff]  ;;  %v74_v7 = vld [vmem:[%s2695_s0 + $0x118] sm:$0xff]  ;;  %v59_v8 = vld [vmem:[%s2695_s0 + $0xa0] sm:$0xff] }
  0x3d   :  { %v60_v9 = vld [vmem:[%s2695_s0 + $0xa8] sm:$0xff]  ;;  %v91_v10 = vld [vmem:[%s2695_s0 + $0x1a0] sm:$0xff]  ;;  %v105_v11 = vld [vmem:[%s2698_s3 + $0x10] sm:$0xff]  ;;  %v1815_v15 = vpack.c.bf16 %v42_v4, %v41_v3 }
  0x3e   :  { %v92_v12 = vld [vmem:[%s2695_s0 + $0x1a8] sm:$0xff]  ;;  %v1336_v13 = vld [vmem:[#allocation2] sm:$0x1]  ;;  %v1263_v14 = vld [vmem:[%s2702_s7 + $0x18] sm:$0xff]  ;;  %v1818_v17 = vpack.c.bf16 %v60_v9, %v59_v8 }
  0x3f   :  { %1266 = vperm.xlu0 %1938, %v1260_v53   ;;  %1271 = vperm.xlu1 %1939, %v1261_v56   ;;  %v1866_v18 = vpack.c.bf16 %v92_v12, %v91_v10  ;;  %v106_v19 = vld [vmem:[%s2698_s3 + $0x18] sm:$0xff]  ;;  %v43_v20 = vld [vmem:[%s2695_s0 + $0x20] sm:$0xff]  ;;  %v44_v21 = vld [vmem:[%s2695_s0 + $0x28] sm:$0xff] }
  0x40   :  { %1757 = vmatpush3.bf16.xpose.msk.msra.mxu0 %vm2032_vm1, %v1755_v46  ;;  %v75_v22 = vld [vmem:[%s2695_s0 + $0x120] sm:$0xff]  ;;  %v76_v23 = vld [vmem:[%s2695_s0 + $0x128] sm:$0xff]  ;;  %v61_v24 = vld [vmem:[%s2695_s0 + $0xb0] sm:$0xff]  ;;  %v1821_v29 = vpack.c.bf16 %v44_v21, %v43_v20 }
  0x41   :  { %1805 = vmatpush3.bf16.xpose.msk.msra.mxu1 %vm2032_vm1, %v1803_v48  ;;  %1808 = vmatprep.subr.msk.bf16.mxu0 %vm2326_vm3, %v1806_v50  ;;  %v2453_v25 = vld [vmem:[%s2697_s2] sm:$0xff]  ;;  %v62_v26 = vld [vmem:[%s2695_s0 + $0xb8] sm:$0xff]  ;;  %v93_v27 = vld [vmem:[%s2695_s0 + $0x1b0] sm:$0xff]  ;;  %v1869_v30 = vpack.c.bf16 %v76_v23, %v75_v22 }
  0x42   :  { %1856 = vmatprep.subr.msk.bf16.mxu1 %vm2326_vm3, %v1854_v51  ;;  %v94_v28 = vld [vmem:[%s2695_s0 + $0x1b8] sm:$0xff]  ;;  %v1824_v31 = vpack.c.bf16 %v62_v26, %v61_v24  ;;  %v45_v33 = vld [vmem:[%s2695_s0 + $0x30] sm:$0xff]  ;;  %v63_v37 = vld [vmem:[%s2695_s0 + $0xc0] sm:$0xff] }
  0x43   :  { %1276 = vperm.xlu0 %1938, %v1262_v62   ;;  %1281 = vperm.xlu1 %1939, %v1263_v14   ;;  %v1872_v32 = vpack.c.bf16 %v94_v28, %v93_v27  ;;  %v46_v34 = vld [vmem:[%s2695_s0 + $0x38] sm:$0xff]  ;;  %v77_v35 = vld [vmem:[%s2695_s0 + $0x130] sm:$0xff]  ;;  %v64_v38 = vld [vmem:[%s2695_s0 + $0xc8] sm:$0xff] }
  0x44   :  { %v78_v36 = vld [vmem:[%s2695_s0 + $0x138] sm:$0xff]  ;;  %v95_v39 = vld [vmem:[%s2695_s0 + $0x1c0] sm:$0xff]  ;;  %v96_v40 = vld [vmem:[%s2695_s0 + $0x1c8] sm:$0xff]  ;;  %v1827_v41 = vpack.c.bf16 %v46_v34, %v45_v33  ;;  %v1830_v43 = vpack.c.bf16 %v64_v38, %v63_v37 }
  0x45   :  { %v1875_v42 = vpack.c.bf16 %v78_v36, %v77_v35  ;;  %v1878_v44 = vpack.c.bf16 %v96_v40, %v95_v39  ;;  %v47_v45 = vld [vmem:[%s2695_s0 + $0x40] sm:$0xff]  ;;  %v48_v46 = vld [vmem:[%s2695_s0 + $0x48] sm:$0xff]  ;;  %v65_v50 = vld [vmem:[%s2695_s0 + $0xd0] sm:$0xff] }
  0x46   :  { %v79_v48 = vld [vmem:[%s2695_s0 + $0x140] sm:$0xff]  ;;  %v80_v49 = vld [vmem:[%s2695_s0 + $0x148] sm:$0xff]  ;;  %v66_v51 = vld [vmem:[%s2695_s0 + $0xd8] sm:$0xff]  ;;  %v1833_v55 = vpack.c.bf16 %v48_v46, %v47_v45 }
  0x47   :  { %1583 = vmatmul.mubr.msk.f32.vlgmr.msra.gmra.mrb[0].mxu0 %vm171_vm0, %v2144_v47  ;;  %1339 = vperm.xlu0 %1938, %v1336_v13   ;;  %v97_v53 = vld [vmem:[%s2695_s0 + $0x1d0] sm:$0xff]  ;;  %v98_v54 = vld [vmem:[%s2695_s0 + $0x1d8] sm:$0xff]  ;;  %v1881_v56 = vpack.c.bf16 %v80_v49, %v79_v48  ;;  %v1836_v5 = vpack.c.bf16 %v66_v51, %v65_v50  ;;  %v67_v62 = vld [vmem:[%s2695_s0 + $0xe0] sm:$0xff] }
  0x48   :  { %1623 = vmatmul.mubr.msk.f32.vlgmr.msra.gmra.mrb[0].mxu1 %vm171_vm0, %v2144_v47  ;;  %1811 = vmatpush3.bf16.xpose.msk.msra.mxu0 %vm2326_vm3, %v1809_v63  ;;  %v73_v47 = vld [vmem:[%s2695_s0 + $0x110] sm:$0xff]  ;;  %v1884_v57 = vpack.c.bf16 %v98_v54, %v97_v53  ;;  %v50_v59 = vld [vmem:[%s2695_s0 + $0x58] sm:$0xff]  ;;  %v68_v63 = vld [vmem:[%s2695_s0 + $0xe8] sm:$0xff] }
  0x49   :  { %1859 = vmatpush3.bf16.xpose.msk.msra.mxu1 %vm2326_vm3, %v1857_v0  ;;  %1814 = vmatprep.subr.msk.bf16.mxu0 %vm2326_vm3, %v1812_v1  ;;  %v1863_v16 = vpack.c.bf16 %v74_v7, %v73_v47  ;;  %v49_v58 = vld [vmem:[%s2695_s0 + $0x50] sm:$0xff]  ;;  %v82_v61 = vld [vmem:[%s2695_s0 + $0x158] sm:$0xff]  ;;  %v99_v0 = vld [vmem:[%s2695_s0 + $0x1e0] sm:$0xff]  ;;  %v1842_v4 = vpack.c.bf16 %v68_v63, %v67_v62 }
  0x4a   :  { %1862 = vmatprep.subr.msk.bf16.mxu1 %vm2326_vm3, %v1860_v2  ;;  %1584 = vmatprep.mubr.msk.f32.mxu0 %vm171_vm0, %v104_v6  ;;  %v81_v60 = vld [vmem:[%s2695_s0 + $0x150] sm:$0xff]  ;;  %v100_v1 = vld [vmem:[%s2695_s0 + $0x1e8] sm:$0xff]  ;;  %v1839_v2 = vpack.c.bf16 %v50_v59, %v49_v58  ;;  %v51_v47 = vld [vmem:[%s2695_s0 + $0x60] sm:$0xff] }
  0x4b   :  { %1624 = vmatprep.mubr.msk.f32.mxu1 %vm171_vm0, %v104_v6  ;;  %1585 = vmatmul.mubr.msk.f32.gmra.mrb[2].mxu0 %vm171_vm0, %v104_v6  ;;  %v1887_v3 = vpack.c.bf16 %v82_v61, %v81_v60  ;;  %v52_v7 = vld [vmem:[%s2695_s0 + $0x68] sm:$0xff]  ;;  %v83_v8 = vld [vmem:[%s2695_s0 + $0x160] sm:$0xff]  ;;  %v69_v10 = vld [vmem:[%s2695_s0 + $0xf0] sm:$0xff] }
  0x4c   :  { %1625 = vmatmul.mubr.msk.f32.gmra.mrb[2].mxu1 %vm171_vm0, %v104_v6  ;;  %1586 = vmatprep.mubr.msk.f32.mxu0 %vm171_vm0, %v105_v11  ;;  %v1890_v6 = vpack.c.bf16 %v100_v1, %v99_v0  ;;  %v84_v9 = vld [vmem:[%s2695_s0 + $0x168] sm:$0xff]  ;;  %v101_v12 = vld [vmem:[%s2695_s0 + $0x1f0] sm:$0xff]  ;;  %v102_v13 = vld [vmem:[%s2695_s0 + $0x1f8] sm:$0xff]  ;;  %v1845_v14 = vpack.c.bf16 %v52_v7, %v51_v47 }
  0x4d   :  { %1626 = vmatprep.mubr.msk.f32.mxu1 %vm171_vm0, %v105_v11  ;;  %v85_v20 = vld [vmem:[%s2695_s0 + $0x170] sm:$0xff]  ;;  %v86_v21 = vld [vmem:[%s2695_s0 + $0x178] sm:$0xff]  ;;  %v36_v24 = vld [vmem:[%s2697_s2 + $0x8] sm:$0xff] }
  0x4e   :  { %v1899_v23 = vpack.c.bf16 %v86_v21, %v85_v20  ;;  %v37_v26 = vld [vmem:[%s2697_s2 + $0x10] sm:$0xff]  ;;  %v38_v52 = vld [vmem:[%s2697_s2 + $0x18] sm:$0xff] }
  0x4f   :  { %1587 = vmatmul.mubr.msk.f32.gmra.mrb[4].mxu0 %vm171_vm0, %v105_v11 }
  0x50   :  { %1627 = vmatmul.mubr.msk.f32.gmra.mrb[4].mxu1 %vm171_vm0, %v105_v11  ;;  %1817 = vmatpush3.bf16.xpose.msk.msra.mxu0 %vm2326_vm3, %v1815_v15  ;;  %v70_v11 = vld [vmem:[%s2695_s0 + $0xf8] sm:$0xff]  ;;  %v1893_v15 = vpack.c.bf16 %v84_v9, %v83_v8 }
  0x51   :  { %1865 = vmatpush3.bf16.xpose.msk.msra.mxu1 %vm2326_vm3, %v1863_v16  ;;  %1820 = vmatprep.subr.msk.bf16.mxu0 %vm2326_vm3, %v1818_v17  ;;  %v1848_v16 = vpack.c.bf16 %v70_v11, %v69_v10  ;;  %v1896_v17 = vpack.c.bf16 %v102_v13, %v101_v12 }
  0x52   :  { %1868 = vmatprep.subr.msk.bf16.mxu1 %vm2326_vm3, %v1866_v18  ;;  %1588 = vmatprep.mubr.msk.f32.mxu0 %vm171_vm0, %v106_v19  ;;  %v53_v18 = vld [vmem:[%s2695_s0 + $0x70] sm:$0xff] }
  0x53   :  { %1628 = vmatprep.mubr.msk.f32.mxu1 %vm171_vm0, %v106_v19  ;;  %1589 = vmatmul.mubr.msk.f32.gmra.mrb[6].mxu0 %vm171_vm0, %v106_v19 }
  0x54   :  { %1629 = vmatmul.mubr.msk.f32.gmra.mrb[6].mxu1 %vm171_vm0, %v106_v19  ;;  %1662 = vmatprep.mubr.msk.f32.mxu0 %vm554_vm2, %v2453_v25  ;;  %v54_v19 = vld [vmem:[%s2695_s0 + $0x78] sm:$0xff] }
  0x55   :  { %1702 = vmatprep.mubr.msk.f32.mxu1 %vm554_vm2, %v2453_v25  ;;  %v1851_v22 = vpack.c.bf16 %v54_v19, %v53_v18 }
  0x58   :  { %1823 = vmatpush3.bf16.xpose.msk.msra.mxu0 %vm2326_vm3, %v1821_v29 }
  0x59   :  { %1871 = vmatpush3.bf16.xpose.msk.msra.mxu1 %vm2326_vm3, %v1869_v30  ;;  %1826 = vmatprep.subr.msk.bf16.mxu0 %vm2326_vm3, %v1824_v31 }
  0x5a   :  { %1874 = vmatprep.subr.msk.bf16.mxu1 %vm2326_vm3, %v1872_v32 }
  0x60   :  { %1829 = vmatpush3.bf16.xpose.msk.msra.mxu0 %vm2326_vm3, %v1827_v41 }
  0x61   :  { %1877 = vmatpush3.bf16.xpose.msk.msra.mxu1 %vm2326_vm3, %v1875_v42  ;;  %1832 = vmatprep.subr.msk.bf16.mxu0 %vm2326_vm3, %v1830_v43 }
  0x62   :  { %1880 = vmatprep.subr.msk.bf16.mxu1 %vm2326_vm3, %v1878_v44 }
  0x68   :  { %1835 = vmatpush3.bf16.xpose.msk.msra.mxu0 %vm2326_vm3, %v1833_v55 }
  0x69   :  { %1883 = vmatpush3.bf16.xpose.msk.msra.mxu1 %vm2326_vm3, %v1881_v56  ;;  %1838 = vmatprep.subr.msk.bf16.mxu0 %vm2326_vm3, %v1836_v5 }
  0x6a   :  { %1886 = vmatprep.subr.msk.bf16.mxu1 %vm2326_vm3, %v1884_v57 }
  0x70   :  { %1841 = vmatpush3.bf16.xpose.msk.msra.mxu0 %vm2326_vm3, %v1839_v2 }
  0x71   :  { %1889 = vmatpush3.bf16.xpose.msk.msra.mxu1 %vm2326_vm3, %v1887_v3  ;;  %1844 = vmatprep.subr.msk.bf16.mxu0 %vm2326_vm3, %v1842_v4 }
  0x72   :  { %1892 = vmatprep.subr.msk.bf16.mxu1 %vm2326_vm3, %v1890_v6 }
  0x78   :  { %1847 = vmatpush3.bf16.xpose.msk.msra.mxu0 %vm2326_vm3, %v1845_v14 }
  0x79   :  { %1895 = vmatpush3.bf16.xpose.msk.msra.mxu1 %vm2326_vm3, %v1893_v15  ;;  %1850 = vmatprep.subr.msk.bf16.mxu0 %vm2326_vm3, %v1848_v16 }
  0x7a   :  { %1898 = vmatprep.subr.msk.bf16.mxu1 %vm2326_vm3, %v1896_v17 }
  0x80   :  { %1853 = vmatpush3.bf16.xpose.msk.msra.mxu0 %vm2326_vm3, %v1851_v22 }
  0x81   :  { %1901 = vmatpush3.bf16.xpose.msk.msra.mxu1 %vm2326_vm3, %v1899_v23 }
  0x87   :  { %1663 = vmatmul.mubr.msk.f32.vlgmr.msra.gmra.mrb[0].mxu0 %vm554_vm2, %v2453_v25 }
  0x88   :  { %1703 = vmatmul.mubr.msk.f32.vlgmr.msra.gmra.mrb[0].mxu1 %vm554_vm2, %v2453_v25  ;;  %1664 = vmatprep.mubr.msk.f32.mxu0 %vm554_vm2, %v36_v24  ;;  %v1965_v25 = vmov 0.0  }
  0x89   :  { %1704 = vmatprep.mubr.msk.f32.mxu1 %vm554_vm2, %v36_v24 }
  0x8b   :  { %1665 = vmatmul.mubr.msk.f32.gmra.mrb[2].mxu0 %vm554_vm2, %v36_v24 }
  0x8c   :  { %1705 = vmatmul.mubr.msk.f32.gmra.mrb[2].mxu1 %vm554_vm2, %v36_v24  ;;  %1666 = vmatprep.mubr.msk.f32.mxu0 %vm554_vm2, %v37_v26 }
  0x8d   :  { %1706 = vmatprep.mubr.msk.f32.mxu1 %vm554_vm2, %v37_v26 }
  0x8f   :  { %1667 = vmatmul.mubr.msk.f32.gmra.mrb[4].mxu0 %vm554_vm2, %v37_v26 }
  0x90   :  { %1707 = vmatmul.mubr.msk.f32.gmra.mrb[4].mxu1 %vm554_vm2, %v37_v26  ;;  %1668 = vmatprep.mubr.msk.f32.mxu0 %vm554_vm2, %v38_v52 }
  0x91   :  { %1708 = vmatprep.mubr.msk.f32.mxu1 %vm554_vm2, %v38_v52 }
  0x93   :  { %1669 = vmatmul.mubr.msk.f32.gmra.mrb[6].mxu0 %vm554_vm2, %v38_v52 }
  0x94   :  { %1709 = vmatmul.mubr.msk.f32.gmra.mrb[6].mxu1 %vm554_vm2, %v38_v52  ;;  %1114 = vmatprep.mubr.f32.mxu0 %v1965_v25 }
  0x95   :  { %1203 = vmatprep.mubr.f32.mxu1 %v1965_v25 }
  0x97   :  { %v944_v27 = vpop.permute.xlu0 %943 }
  0x99   :  { %v954_v37 = vpop.permute.xlu1 %953 }
  0xb2   :  { %v949_v36 = vpop.permute.xlu0 %948  ;;  %v959_v7 = vpop.permute.xlu1 %958 }
 0x15a   :  { %v825_v28 = vpop.f32.mrb[0].mxu0 }
 0x15b   :  { %v914_v29 = vpop.f32.mrb[0].mxu1  ;;  %v961_v30 = vadd.f32 %v944_v27, %v825_v28  ;;  %v827_v32 = vpop.f32.mrb[1].mxu0 }
 0x15c   :  { %v963_v31 = vadd.f32 %v944_v27, %v914_v29  ;;  %v916_v33 = vpop.f32.mrb[1].mxu1  ;;  %v962_v34 = vadd.f32 %v944_v27, %v827_v32 }
 0x15d   :  { %v964_v35 = vadd.f32 %v944_v27, %v916_v33  ;;  %v977_v38 = vmul.f32 0.2, %v961_v30 }
 0x15e   :  { %v979_v39 = vmul.f32 0.2, %v963_v31  ;;  %v978_v40 = vmul.f32 0.2, %v962_v34  ;;  %v831_v42 = vpop.f32.mrb[2].mxu0 }
 0x15f   :  { %v980_v41 = vmul.f32 0.2, %v964_v35  ;;  %v920_v43 = vpop.f32.mrb[2].mxu1  ;;  %v965_v44 = vadd.f32 %v949_v36, %v831_v42  ;;  %v833_v46 = vpop.f32.mrb[3].mxu0  ;;  %v993_v51 = vmax.f32 %v961_v30, %v977_v38  ;;  %v1011_v42 = vld [vmem:[%s2700_s5 + $0x10] sm:$0xff] }
 0x160   :  { %v967_v45 = vadd.f32 %v949_v36, %v920_v43  ;;  %v922_v48 = vpop.f32.mrb[3].mxu1  ;;  %v966_v49 = vadd.f32 %v949_v36, %v833_v46  ;;  %v995_v53 = vmax.f32 %v963_v31, %v979_v39  ;;  %v994_v56 = vmax.f32 %v962_v34, %v978_v40  ;;  %v1009_v40 = vld [vmem:[%s2700_s5] sm:$0xff]  ;;  %v1012_v43 = vld [vmem:[%s2700_s5 + $0x18] sm:$0xff] }
 0x161   :  { %v968_v50 = vadd.f32 %v949_v36, %v922_v48  ;;  %v981_v54 = vmul.f32 0.2, %v965_v44  ;;  %v996_v5 = vmax.f32 %v964_v35, %v980_v41  ;;  %v1010_v41 = vld [vmem:[%s2700_s5 + $0x8] sm:$0xff]  ;;  %s1967_s5 = smov [#allocation3]  }
 0x162   :  { %v983_v55 = vmul.f32 0.2, %v967_v45  ;;  %v982_v57 = vmul.f32 0.2, %v966_v49  ;;  %v837_v59 = vpop.f32.mrb[4].mxu0  ;;  %s1390_s21 = sshll.u32 %s1967_s5, 4  ;;  %s1391_s21 = int_to_ptr.vmem [resolvable:$true] %s1390_s21 }
 0x163   :  { %v984_v58 = vmul.f32 0.2, %v968_v50  ;;  %v926_v60 = vpop.f32.mrb[4].mxu1  ;;  %v997_v61 = vmax.f32 %v965_v44, %v981_v54  ;;  %v969_v63 = vadd.f32 %v954_v37, %v837_v59  ;;  %v839_v1 = vpop.f32.mrb[5].mxu0  ;;  %s1940_s22 = scalar_lea.vmem %s1391_s21, 64  ;;  %p1945_p1 = scmp.lt.s32.totalorder %s1391_s21, %s1391_s21 }
 0x164   :  { %v999_v62 = vmax.f32 %v967_v45, %v983_v55  ;;  %v971_v0 = vadd.f32 %v954_v37, %v926_v60  ;;  %v928_v2 = vpop.f32.mrb[5].mxu1  ;;  %v998_v3 = vmax.f32 %v966_v49, %v982_v57  ;;  %v970_v6 = vadd.f32 %v954_v37, %v839_v1  ;;  %v1020_v44 = vpop.permute.xlu0 %1019  ;;  %p1941_p0 = scmp.ne.s32.totalorder %s1391_s21, %s1940_s22  ;;  %p1946_p2 = scmp.lt.s32.totalorder %s1940_s22, %s1940_s22 }
 0x165   :  { %v1000_v4 = vmax.f32 %v968_v50, %v984_v58  ;;  %v972_v47 = vadd.f32 %v954_v37, %v928_v2  ;;  %v1904_v8 = vpack.c.bf16 %v997_v61, %v993_v51  ;;  %v985_v14 = vmul.f32 0.2, %v969_v63  ;;  %v1025_v45 = vpop.permute.xlu1 %1024 }
 0x166   :  { %v1912_v9 = vpack.c.bf16 %v999_v62, %v995_v53  ;;  %v843_v10 = vpop.f32.mrb[6].mxu0  ;;  %v1902_v12 = vpack.c.bf16 %v998_v3, %v994_v56  ;;  %v987_v15 = vmul.f32 0.2, %v971_v0  ;;  %v986_v20 = vmul.f32 0.2, %v970_v6  ;;  %p1947_p3 = por %p1946_p2, %p1945_p1 }
 0x167   :  { %v932_v11 = vpop.f32.mrb[6].mxu1  ;;  %v1910_v13 = vpack.c.bf16 %v1000_v4, %v996_v5  ;;  %v973_v16 = vadd.f32 %v959_v7, %v843_v10  ;;  %v845_v18 = vpop.f32.mrb[7].mxu0  ;;  %v988_v21 = vmul.f32 0.2, %v972_v47  ;;  %v1001_v28 = vmax.f32 %v969_v63, %v985_v14 }
 0x168   :  { %v975_v17 = vadd.f32 %v959_v7, %v932_v11  ;;  %v934_v19 = vpop.f32.mrb[7].mxu1  ;;  %v974_v22 = vadd.f32 %v959_v7, %v845_v18  ;;  %1903 = vmatprep.subr.bf16.mxu0 %v1902_v12  ;;  %v1003_v29 = vmax.f32 %v971_v0, %v987_v15  ;;  %v1002_v32 = vmax.f32 %v970_v6, %v986_v20  ;;  %v1030_v46 = vpop.permute.xlu0 %1029  ;;  %p1948_p4 = pnand %p1947_p3, %p1941_p0 }
 0x169   :  { %v976_v23 = vadd.f32 %v959_v7, %v934_v19  ;;  %v989_v24 = vmul.f32 0.2, %v973_v16  ;;  %1911 = vmatprep.subr.bf16.mxu1 %v1910_v13  ;;  %1905 = vmatpush1.bf16.msra.mxu0 %v1904_v8  ;;  %v1004_v33 = vmax.f32 %v972_v47, %v988_v21 }
 0x16a   :  { %v991_v26 = vmul.f32 0.2, %v975_v17  ;;  %v990_v52 = vmul.f32 0.2, %v974_v22  ;;  %1913 = vmatpush1.bf16.msra.mxu1 %v1912_v9 }
 0x16b   :  { %v992_v27 = vmul.f32 0.2, %v976_v23  ;;  %v1005_v30 = vmax.f32 %v973_v16, %v989_v24 }
 0x16c   :  { %v1007_v31 = vmax.f32 %v975_v17, %v991_v26  ;;  %v1006_v34 = vmax.f32 %v974_v22, %v990_v52  ;;  %v1267_v4 = vpop.permute.xlu0 %1266 }
 0x16d   :  { %v1008_v35 = vmax.f32 %v976_v23, %v992_v27  ;;  %v1908_v36 = vpack.c.bf16 %v1005_v30, %v1001_v28 }
 0x16e   :  { %v1916_v37 = vpack.c.bf16 %v1007_v31, %v1003_v29  ;;  %v1906_v38 = vpack.c.bf16 %v1006_v34, %v1002_v32 }
 0x16f   :  { %v1914_v39 = vpack.c.bf16 %v1008_v35, %v1004_v33 }
 0x170   :  { %1907 = vmatprep.subr.bf16.mxu0 %v1906_v38 }
 0x171   :  { %1915 = vmatprep.subr.bf16.mxu1 %v1914_v39  ;;  %1909 = vmatpush1.bf16.msra.mxu0 %v1908_v36 }
 0x172   :  { %1917 = vmatpush1.bf16.msra.mxu1 %v1916_v37 }
 0x174   :  { %1542 = vmatmul.mubr.msk.f32.vlgmr.msra.gmra.mrb[8].mxu0 %vm1037_vm4, %v1009_v40 }
 0x175   :  { %1546 = vmatmul.mubr.msk.f32.vlgmr.msra.gmra.mrb[8].mxu1 %vm1037_vm4, %v1009_v40  ;;  %1120 = vmatprep.mubr.f32.mxu0 %v1965_v25 }
 0x176   :  { %1209 = vmatprep.mubr.f32.mxu1 %v1965_v25 }
 0x178   :  { %1543 = vmatmul.mubr.msk.f32.gmra.mrb[10].mxu0 %vm1037_vm4, %v1010_v41 }
 0x179   :  { %1547 = vmatmul.mubr.msk.f32.gmra.mrb[10].mxu1 %vm1037_vm4, %v1010_v41  ;;  %1126 = vmatprep.mubr.f32.mxu0 %v1965_v25 }
 0x17a   :  { %1215 = vmatprep.mubr.f32.mxu1 %v1965_v25 }
 0x17c   :  { %1544 = vmatmul.mubr.msk.f32.gmra.mrb[12].mxu0 %vm1037_vm4, %v1011_v42 }
 0x17d   :  { %1548 = vmatmul.mubr.msk.f32.gmra.mrb[12].mxu1 %vm1037_vm4, %v1011_v42  ;;  %1132 = vmatprep.mubr.f32.mxu0 %v1965_v25 }
 0x17e   :  { %1221 = vmatprep.mubr.f32.mxu1 %v1965_v25  ;;  %v2677_v25 = vpop.permute.xlu1 %1034 }
 0x180   :  { %1545 = vmatmul.mubr.msk.f32.gmra.mrb[14].mxu0 %vm1037_vm4, %v1012_v43 }
 0x181   :  { %1549 = vmatmul.mubr.msk.f32.gmra.mrb[14].mxu1 %vm1037_vm4, %v1012_v43 }
 0x182   :  { %v1272_v26 = vpop.permute.xlu1 %1271 }
 0x247   :  { %v1116_v48 = vpop.f32.mrb[8].mxu0 }
 0x248   :  { %v1205_v49 = vpop.f32.mrb[8].mxu1  ;;  %v1117_v50 = vadd.f32 %v1116_v48, %v1020_v44  ;;  %v1118_v53 = vpop.f32.mrb[9].mxu0 }
 0x249   :  { %v1206_v51 = vadd.f32 %v1205_v49, %v1020_v44  ;;  %v1207_v54 = vpop.f32.mrb[9].mxu1  ;;  %v1119_v55 = vadd.f32 %v1118_v53, %v1020_v44  ;;  %v1277_v48 = vpop.permute.xlu0 %1276 }
 0x24a   :  { %v1208_v56 = vadd.f32 %v1207_v54, %v1020_v44  ;;  %v1228_v5 = vmul.f32 0.2, %v1117_v50 }
 0x24b   :  { %v1230_v57 = vmul.f32 0.2, %v1206_v51  ;;  %v1229_v58 = vmul.f32 0.2, %v1119_v55  ;;  %v1122_v60 = vpop.f32.mrb[10].mxu0 }
 0x24c   :  { %v1231_v59 = vmul.f32 0.2, %v1208_v56  ;;  %v1211_v61 = vpop.f32.mrb[10].mxu1  ;;  %v1244_v62 = vmax.f32 %v1117_v50, %v1228_v5  ;;  %v1123_v0 = vadd.f32 %v1122_v60, %v1025_v45  ;;  %v1124_v2 = vpop.f32.mrb[11].mxu0 }
 0x24d   :  { %v1246_v63 = vmax.f32 %v1206_v51, %v1230_v57  ;;  %v1212_v1 = vadd.f32 %v1211_v61, %v1025_v45  ;;  %v1213_v3 = vpop.f32.mrb[11].mxu1  ;;  %v1245_v6 = vmax.f32 %v1119_v55, %v1229_v58  ;;  %v1125_v7 = vadd.f32 %v1124_v2, %v1025_v45 }
 0x24e   :  { %v1247_v47 = vmax.f32 %v1208_v56, %v1231_v59  ;;  %v1214_v8 = vadd.f32 %v1213_v3, %v1025_v45  ;;  %v1284_v9 = vmul.f32 %v1267_v4, %v1244_v62  ;;  %v1232_v11 = vmul.f32 0.2, %v1123_v0 }
 0x24f   :  { %v1286_v10 = vmul.f32 %v1267_v4, %v1246_v63  ;;  %v1234_v12 = vmul.f32 0.2, %v1212_v1  ;;  %v1285_v13 = vmul.f32 %v1267_v4, %v1245_v6  ;;  %v1233_v15 = vmul.f32 0.2, %v1125_v7  ;;  %v1128_v17 = vpop.f32.mrb[12].mxu0 }
 0x250   :  { %v1287_v14 = vmul.f32 %v1267_v4, %v1247_v47  ;;  %v1235_v16 = vmul.f32 0.2, %v1214_v8  ;;  %v1217_v18 = vpop.f32.mrb[12].mxu1  ;;  %v1248_v19 = vmax.f32 %v1123_v0, %v1232_v11  ;;  %v1129_v21 = vadd.f32 %v1128_v17, %v1030_v46  ;;  %v1130_v23 = vpop.f32.mrb[13].mxu0 }
 0x251   :  { %v1250_v20 = vmax.f32 %v1212_v1, %v1234_v12  ;;  %v1218_v22 = vadd.f32 %v1217_v18, %v1030_v46  ;;  %v1219_v24 = vpop.f32.mrb[13].mxu1  ;;  %v1249_v52 = vmax.f32 %v1125_v7, %v1233_v15  ;;  %v1131_v28 = vadd.f32 %v1130_v23, %v1030_v46  ;;  %v1282_v47 = vpop.permute.xlu1 %1281 }
 0x252   :  { %v1251_v27 = vmax.f32 %v1214_v8, %v1235_v16  ;;  %v1220_v29 = vadd.f32 %v1219_v24, %v1030_v46  ;;  %v1288_v30 = vmul.f32 %v1272_v26, %v1248_v19  ;;  %v1236_v32 = vmul.f32 0.2, %v1129_v21 }
 0x253   :  { %v1290_v31 = vmul.f32 %v1272_v26, %v1250_v20  ;;  %v1238_v33 = vmul.f32 0.2, %v1218_v22  ;;  %v1289_v34 = vmul.f32 %v1272_v26, %v1249_v52  ;;  %v1237_v36 = vmul.f32 0.2, %v1131_v28  ;;  %v1134_v38 = vpop.f32.mrb[14].mxu0 }
 0x254   :  { %v1291_v35 = vmul.f32 %v1272_v26, %v1251_v27  ;;  %v1239_v37 = vmul.f32 0.2, %v1220_v29  ;;  %v1223_v39 = vpop.f32.mrb[14].mxu1  ;;  %v1300_v40 = vadd.f32 %v1288_v30, %v1284_v9  ;;  %v1252_v42 = vmax.f32 %v1129_v21, %v1236_v32  ;;  %v1136_v44 = vpop.f32.mrb[15].mxu0 }
 0x255   :  { %v1318_v41 = vadd.f32 %v1290_v31, %v1286_v10  ;;  %v1254_v43 = vmax.f32 %v1218_v22, %v1238_v33  ;;  %v1225_v45 = vpop.f32.mrb[15].mxu1  ;;  %v1309_v49 = vadd.f32 %v1289_v34, %v1285_v13  ;;  %v1253_v46 = vmax.f32 %v1131_v28, %v1237_v36 }
 0x256   :  { %v1327_v50 = vadd.f32 %v1291_v35, %v1287_v14  ;;  %v1255_v51 = vmax.f32 %v1220_v29, %v1239_v37  ;;  %v1292_v53 = vmul.f32 %v1277_v48, %v1252_v42  ;;  %v1135_v55 = vadd.f32 %v1134_v38, %v2677_v25  ;;  %v1340_v35 = vpop.permute.xlu0 %1339 }
 0x257   :  { %v1294_v54 = vmul.f32 %v1277_v48, %v1254_v43  ;;  %v1224_v56 = vadd.f32 %v1223_v39, %v2677_v25  ;;  %v1293_v5 = vmul.f32 %v1277_v48, %v1253_v46  ;;  %v1137_v58 = vadd.f32 %v1136_v44, %v2677_v25 }
 0x258   :  { %v1295_v57 = vmul.f32 %v1277_v48, %v1255_v51  ;;  %v1226_v59 = vadd.f32 %v1225_v45, %v2677_v25  ;;  %v1301_v60 = vadd.f32 %v1300_v40, %v1292_v53  ;;  %v1240_v62 = vmul.f32 0.2, %v1135_v55 }
 0x259   :  { %v1319_v61 = vadd.f32 %v1318_v41, %v1294_v54  ;;  %v1242_v63 = vmul.f32 0.2, %v1224_v56  ;;  %v1310_v0 = vadd.f32 %v1309_v49, %v1293_v5  ;;  %v1241_v2 = vmul.f32 0.2, %v1137_v58 }
 0x25a   :  { %v1328_v1 = vadd.f32 %v1327_v50, %v1295_v57  ;;  %v1243_v3 = vmul.f32 0.2, %v1226_v59  ;;  %v1256_v4 = vmax.f32 %v1135_v55, %v1240_v62  ;;  %v1342_v13 = vlaneseq }
 0x25b   :  { %v1258_v6 = vmax.f32 %v1224_v56, %v1242_v63  ;;  %v1257_v7 = vmax.f32 %v1137_v58, %v1241_v2  ;;  %v1966_v28 = vmov 1966171168  }
 0x25c   :  { %v1259_v8 = vmax.f32 %v1226_v59, %v1243_v3  ;;  %v1296_v9 = vmul.f32 %v1282_v47, %v1256_v4  ;;  %v1343_v21 = vshrl.u32 %v1342_v13, 7  ;;  %v1357_v29 = vunpack.c.l.s4 %v1966_v28 }
 0x25d   :  { %v1298_v10 = vmul.f32 %v1282_v47, %v1258_v6  ;;  %v1297_v11 = vmul.f32 %v1282_v47, %v1257_v7  ;;  %vm1381_vm5 = vcmp.lt.s32.totalorder %v1342_v13, 512 }
 0x25e   :  { %v1299_v12 = vmul.f32 %v1282_v47, %v1259_v8  ;;  %v1302_v14 = vadd.f32 %v1301_v60, %v1296_v9  ;;  %v1344_v32 = vsub.s32 0, %v1343_v21  ;;  %v1358_v40 = vunpack.c.0.s8 %v1357_v29 }
 0x25f   :  { %v1320_v25 = vadd.f32 %v1319_v61, %v1298_v10  ;;  %v1311_v15 = vadd.f32 %v1310_v0, %v1297_v11 }
 0x260   :  { %v1329_v16 = vadd.f32 %v1328_v1, %v1299_v12  ;;  %v1303_v17 = vrot.slane %v1302_v14, 4  ;;  %v1345_v43 = vrot.slane %v1340_v35, %v1344_v32  ;;  %v1361_v51 = vsub.s32 %v1358_v40, %v1343_v21 }
 0x261   :  { %v1321_v18 = vrot.slane %v1320_v25, 4  ;;  %v1312_v19 = vrot.slane %v1311_v15, 4 }
 0x262   :  { %v1330_v20 = vrot.slane %v1329_v16, 4  ;;  %v1304_v22 = vadd.f32 %v1303_v17, %v1302_v14 }
 0x263   :  { %v1322_v23 = vadd.f32 %v1321_v18, %v1320_v25  ;;  %v1313_v24 = vadd.f32 %v1312_v19, %v1311_v15 }
 0x264   :  { %v1331_v26 = vadd.f32 %v1330_v20, %v1329_v16  ;;  %v1305_v52 = vrot.slane %v1304_v22, 2 }
 0x265   :  { %v1323_v27 = vrot.slane %v1322_v23, 2  ;;  %v1314_v30 = vrot.slane %v1313_v24, 2 }
 0x266   :  { %v1332_v31 = vrot.slane %v1331_v26, 2  ;;  %v1306_v33 = vadd.f32 %v1305_v52, %v1304_v22 }
 0x267   :  { %v1324_v34 = vadd.f32 %v1323_v27, %v1322_v23  ;;  %v1315_v36 = vadd.f32 %v1314_v30, %v1313_v24 }
 0x268   :  { %v1333_v37 = vadd.f32 %v1332_v31, %v1331_v26  ;;  %v1307_v38 = vrot.slane %v1306_v33, 1 }
 0x269   :  { %v1325_v39 = vrot.slane %v1324_v34, 1  ;;  %v1316_v41 = vrot.slane %v1315_v36, 1 }
 0x26a   :  { %v1334_v42 = vrot.slane %v1333_v37, 1  ;;  %v1308_v44 = vadd.f32 %v1307_v38, %v1306_v33 }
 0x26b   :  { %v1326_v45 = vadd.f32 %v1325_v39, %v1324_v34  ;;  %v1317_v48 = vadd.f32 %v1316_v41, %v1315_v36 }
 0x26c   :  { %v1335_v49 = vadd.f32 %v1334_v42, %v1333_v37  ;;  %v1346_v50 = vadd.f32 %v1345_v43, %v1308_v44 }
 0x26d   :  { %v1348_v46 = vadd.f32 %v1345_v43, %v1326_v45  ;;  %v1347_v53 = vadd.f32 %v1345_v43, %v1317_v48 }
 0x26e   :  { %v1349_v54 = vadd.f32 %v1345_v43, %v1335_v49 }
 0x26f   :  { %v1354_v55 = vcombine.low %v1346_v50, %v1347_v53 }
 0x270   :  { %v1355_v56 = vcombine.low %v1348_v46, %v1349_v54 }
 0x271   :  { %v1362_v5 = vrot.slane %v1354_v55, %v1361_v51 }
 0x272   :  { %v1369_v57 = vrot.slane %v1355_v56, %v1361_v51 }
 0x274   :  { %v1370_v58 = vcombine.low %v1362_v5, %v1369_v57 }
 0x276   :  { %v1377_v59 = vrot.slane %v1370_v58, %v1361_v51 }
 0x278   :  { %1383 = vst.msk [vmem:[#allocation3] sm:$0xf] %vm1381_vm5, %v1377_v59 }
 0x279   :  { %1951 = shalt.err (!%p1948_p4)
}
 0x27a   :  { %s1952_s25 = scalar_lea.hbm %s2704_s9, 64 }
 0x27b   :  { %p1953_p5 = scmp.ne.s32.totalorder %s2704_s9, %s1952_s25  ;;  %p1956_p6 = scmp.lt.u32.totalorder %s1952_s25, %s2704_s9 }
 0x27d   :  { %p1958_p7 = pnand %p1956_p6, %p1953_p5 }
 0x27f   :  { %1961 = shalt.err (!%p1958_p7)
}
 0x280   :  { %1393 = dma.vmem_to_hbm [thread:$0]  %s1391_s21, 64, %s2704_s9, [#allocation4]  }
 0x281   :  { %1962 = dma.done.wait [#allocation4], 64  }
 0x282   :  { %1963 = vsyncadd [#allocation4], 4294967232 }
 0x283   :  { %1397 = vsyncpa [#allocation4], 1 }

// kernel: tpu_custom_call.1
= control target key start
LH: loop header
LB: loop body
LE: loop exit
PB: predicated region body
PF: predicated region fallthrough
CT: control target
= control target key end

     0   :  { %s2695_s0 = inlined_call_operand.vmem [shape: f32[512,16], index: 0, kind: input, shape index: {}]   ;;  %s2696_s1 = inlined_call_operand.vmem [shape: f32[512,24], index: 1, kind: input, shape index: {}]   ;;  %s2697_s2 = inlined_call_operand.vmem [shape: f32[32,16], index: 2, kind: input, shape index: {}]   ;;  %s2698_s3 = inlined_call_operand.vmem [shape: f32[32,24], index: 3, kind: input, shape index: {}]   ;;  %s2699_s4 = inlined_call_operand.vmem [shape: f32[32,1], index: 4, kind: input, shape index: {}]   ;;  %s2700_s5 = inlined_call_operand.vmem [shape: f32[32,32], index: 5, kind: input, shape index: {}]   ;;  %s2701_s6 = inlined_call_operand.vmem [shape: f32[32,1], index: 6, kind: input, shape index: {}]   ;;  %s2702_s7 = inlined_call_operand.vmem [shape: f32[32,1], index: 7, kind: input, shape index: {}]   ;;  %s2703_s8 = inlined_call_operand.<no memory space> [shape: f32[1,1], index: 8, kind: input, shape index: {}]   ;;  %s2704_s9 = inlined_call_operand.hbm [shape: f32[1,512], index: 9, kind: output, shape index: {}]  }
   0x1   :  { %v14_v0 = vstv %s2703_s8 }
   0x2   :  { %15 = vst [vmem:[#allocation2] sm:$0x1] %v14_v0 }
   0x3   :  { %v123_v1 = vld [vmem:[%s2696_s1 + $0x80] sm:$0xff]  ;;  %v124_v2 = vld [vmem:[%s2696_s1 + $0x88] sm:$0xff]  ;;  %vm171_vm0 = vcmask 195584   ;;  %v125_v14 = vld [vmem:[%s2696_s1 + $0x90] sm:$0xff]  ;;  %v1964_v42 = vmov 0  }
   0x4   :  { %v155_v3 = vld [vmem:[%s2696_s1 + $0x180] sm:$0xff]  ;;  %v1710_v4 = vpack.c.bf16 %v124_v2, %v123_v1  ;;  %vm2032_vm1 = vmpackc.low %vm171_vm0, %vm171_vm0  ;;  %v156_v6 = vld [vmem:[%s2696_s1 + $0x188] sm:$0xff]  ;;  %1938 = vset.pattern.permute.xlu0 %v1964_v42  ;;  %1939 = vset.pattern.permute.xlu1 %v1964_v42 }
   0x5   :  { %v107_v7 = vld [vmem:[%s2696_s1] sm:$0xff]  ;;  %v1758_v8 = vpack.c.bf16 %v156_v6, %v155_v3  ;;  %v108_v9 = vld [vmem:[%s2696_s1 + $0x8] sm:$0xff]  ;;  %v126_v15 = vld [vmem:[%s2696_s1 + $0x98] sm:$0xff] }
   0x6   :  { %v139_v10 = vld [vmem:[%s2696_s1 + $0x100] sm:$0xff]  ;;  %v140_v11 = vld [vmem:[%s2696_s1 + $0x108] sm:$0xff]  ;;  %1712 = vmatprep.subr.msk.bf16.mxu0 %vm2032_vm1, %v1710_v4  ;;  %v1713_v12 = vpack.c.bf16 %v108_v9, %v107_v7  ;;  %v157_v16 = vld [vmem:[%s2696_s1 + $0x190] sm:$0xff]  ;;  %v1716_v17 = vpack.c.bf16 %v126_v15, %v125_v14 }
   0x7   :  { %v1761_v13 = vpack.c.bf16 %v140_v11, %v139_v10  ;;  %1760 = vmatprep.subr.msk.bf16.mxu1 %vm2032_vm1, %v1758_v8  ;;  %v158_v18 = vld [vmem:[%s2696_s1 + $0x198] sm:$0xff]  ;;  %v109_v20 = vld [vmem:[%s2696_s1 + $0x10] sm:$0xff]  ;;  %v127_v24 = vld [vmem:[%s2696_s1 + $0xa0] sm:$0xff] }
   0x8   :  { %1715 = vmatpush3.bf16.xpose.msk.msra.mxu0 %vm2032_vm1, %v1713_v12  ;;  %v1764_v19 = vpack.c.bf16 %v158_v18, %v157_v16  ;;  %v110_v21 = vld [vmem:[%s2696_s1 + $0x18] sm:$0xff]  ;;  %v141_v22 = vld [vmem:[%s2696_s1 + $0x110] sm:$0xff]  ;;  %v128_v25 = vld [vmem:[%s2696_s1 + $0xa8] sm:$0xff] }
   0x9   :  { %1763 = vmatpush3.bf16.xpose.msk.msra.mxu1 %vm2032_vm1, %v1761_v13  ;;  %1718 = vmatprep.subr.msk.bf16.mxu0 %vm2032_vm1, %v1716_v17  ;;  %v142_v23 = vld [vmem:[%s2696_s1 + $0x118] sm:$0xff]  ;;  %v159_v26 = vld [vmem:[%s2696_s1 + $0x1a0] sm:$0xff]  ;;  %v160_v27 = vld [vmem:[%s2696_s1 + $0x1a8] sm:$0xff]  ;;  %v1719_v28 = vpack.c.bf16 %v110_v21, %v109_v20  ;;  %v1722_v30 = vpack.c.bf16 %v128_v25, %v127_v24 }
   0xa   :  { %1766 = vmatprep.subr.msk.bf16.mxu1 %vm2032_vm1, %v1764_v19  ;;  %v1767_v29 = vpack.c.bf16 %v142_v23, %v141_v22  ;;  %v1770_v31 = vpack.c.bf16 %v160_v27, %v159_v26  ;;  %v111_v32 = vld [vmem:[%s2696_s1 + $0x20] sm:$0xff]  ;;  %v112_v33 = vld [vmem:[%s2696_s1 + $0x28] sm:$0xff]  ;;  %v129_v36 = vld [vmem:[%s2696_s1 + $0xb0] sm:$0xff] }
   0xb   :  { %v143_v34 = vld [vmem:[%s2696_s1 + $0x120] sm:$0xff]  ;;  %v144_v35 = vld [vmem:[%s2696_s1 + $0x128] sm:$0xff]  ;;  %v130_v37 = vld [vmem:[%s2696_s1 + $0xb8] sm:$0xff]  ;;  %v1725_v40 = vpack.c.bf16 %v112_v33, %v111_v32 }
   0xc   :  { %v161_v38 = vld [vmem:[%s2696_s1 + $0x1b0] sm:$0xff]  ;;  %v162_v39 = vld [vmem:[%s2696_s1 + $0x1b8] sm:$0xff]  ;;  %v1773_v41 = vpack.c.bf16 %v144_v35, %v143_v34  ;;  %v1728_v43 = vpack.c.bf16 %v130_v37, %v129_v36  ;;  %v2144_v47 = vld [vmem:[%s2698_s3] sm:$0xff] }
   0xd   :  { %v1776_v44 = vpack.c.bf16 %v162_v39, %v161_v38  ;;  %v113_v45 = vld [vmem:[%s2696_s1 + $0x30] sm:$0xff]  ;;  %v114_v46 = vld [vmem:[%s2696_s1 + $0x38] sm:$0xff]  ;;  %v131_v50 = vld [vmem:[%s2696_s1 + $0xc0] sm:$0xff]  ;;  %1582 = vmatprep.mubr.msk.f32.mxu0 %vm171_vm0, %v2144_v47  ;;  %1622 = vmatprep.mubr.msk.f32.mxu1 %vm171_vm0, %v2144_v47 }
   0xe   :  { %v145_v48 = vld [vmem:[%s2696_s1 + $0x130] sm:$0xff]  ;;  %v146_v49 = vld [vmem:[%s2696_s1 + $0x138] sm:$0xff]  ;;  %v132_v51 = vld [vmem:[%s2696_s1 + $0xc8] sm:$0xff]  ;;  %v1731_v54 = vpack.c.bf16 %v114_v46, %v113_v45 }
   0xf   :  { %v163_v52 = vld [vmem:[%s2696_s1 + $0x1c0] sm:$0xff]  ;;  %v164_v53 = vld [vmem:[%s2696_s1 + $0x1c8] sm:$0xff]  ;;  %v1779_v55 = vpack.c.bf16 %v146_v49, %v145_v48  ;;  %v1734_v56 = vpack.c.bf16 %v132_v51, %v131_v50  ;;  %v133_v62 = vld [vmem:[%s2696_s1 + $0xd0] sm:$0xff] }
  0x10   :  { %1721 = vmatpush3.bf16.xpose.msk.msra.mxu0 %vm2032_vm1, %v1719_v28  ;;  %v1782_v57 = vpack.c.bf16 %v164_v53, %v163_v52  ;;  %v115_v58 = vld [vmem:[%s2696_s1 + $0x40] sm:$0xff]  ;;  %v116_v59 = vld [vmem:[%s2696_s1 + $0x48] sm:$0xff]  ;;  %v134_v63 = vld [vmem:[%s2696_s1 + $0xd8] sm:$0xff] }
  0x11   :  { %1769 = vmatpush3.bf16.xpose.msk.msra.mxu1 %vm2032_vm1, %v1767_v29  ;;  %1724 = vmatprep.subr.msk.bf16.mxu0 %vm2032_vm1, %v1722_v30  ;;  %v147_v60 = vld [vmem:[%s2696_s1 + $0x140] sm:$0xff]  ;;  %v148_v61 = vld [vmem:[%s2696_s1 + $0x148] sm:$0xff]  ;;  %v165_v0 = vld [vmem:[%s2696_s1 + $0x1d0] sm:$0xff]  ;;  %v1737_v2 = vpack.c.bf16 %v116_v59, %v115_v58  ;;  %v1740_v4 = vpack.c.bf16 %v134_v63, %v133_v62 }
  0x12   :  { %1772 = vmatprep.subr.msk.bf16.mxu1 %vm2032_vm1, %v1770_v31  ;;  %v166_v1 = vld [vmem:[%s2696_s1 + $0x1d8] sm:$0xff]  ;;  %v1785_v3 = vpack.c.bf16 %v148_v61, %v147_v60  ;;  %v117_v7 = vld [vmem:[%s2696_s1 + $0x50] sm:$0xff]  ;;  %v135_v11 = vld [vmem:[%s2696_s1 + $0xe0] sm:$0xff] }
  0x13   :  { %v1788_v6 = vpack.c.bf16 %v166_v1, %v165_v0  ;;  %v118_v8 = vld [vmem:[%s2696_s1 + $0x58] sm:$0xff]  ;;  %v149_v9 = vld [vmem:[%s2696_s1 + $0x150] sm:$0xff]  ;;  %v136_v12 = vld [vmem:[%s2696_s1 + $0xe8] sm:$0xff] }
  0x14   :  { %v150_v10 = vld [vmem:[%s2696_s1 + $0x158] sm:$0xff]  ;;  %v167_v13 = vld [vmem:[%s2696_s1 + $0x1e0] sm:$0xff]  ;;  %v168_v14 = vld [vmem:[%s2696_s1 + $0x1e8] sm:$0xff]  ;;  %v1743_v15 = vpack.c.bf16 %v118_v8, %v117_v7  ;;  %v1746_v17 = vpack.c.bf16 %v136_v12, %v135_v11 }
  0x15   :  { %v1791_v16 = vpack.c.bf16 %v150_v10, %v149_v9  ;;  %v1794_v18 = vpack.c.bf16 %v168_v14, %v167_v13  ;;  %v119_v19 = vld [vmem:[%s2696_s1 + $0x60] sm:$0xff]  ;;  %v120_v20 = vld [vmem:[%s2696_s1 + $0x68] sm:$0xff]  ;;  %v137_v23 = vld [vmem:[%s2696_s1 + $0xf0] sm:$0xff] }
  0x16   :  { %v151_v21 = vld [vmem:[%s2696_s1 + $0x160] sm:$0xff]  ;;  %v152_v22 = vld [vmem:[%s2696_s1 + $0x168] sm:$0xff]  ;;  %v138_v24 = vld [vmem:[%s2696_s1 + $0xf8] sm:$0xff]  ;;  %v1749_v30 = vpack.c.bf16 %v120_v20, %v119_v19 }
  0x17   :  { %v937_v25 = vld [vmem:[%s2699_s4] sm:$0xff]  ;;  %v169_v26 = vld [vmem:[%s2696_s1 + $0x1f0] sm:$0xff]  ;;  %v170_v27 = vld [vmem:[%s2696_s1 + $0x1f8] sm:$0xff]  ;;  %v1797_v31 = vpack.c.bf16 %v152_v22, %v151_v21  ;;  %v1752_v33 = vpack.c.bf16 %v138_v24, %v137_v23 }
  0x18   :  { %1727 = vmatpush3.bf16.xpose.msk.msra.mxu0 %vm2032_vm1, %v1725_v40  ;;  %943 = vperm.xlu0 %1938, %v937_v25   ;;  %v939_v28 = vld [vmem:[%s2699_s4 + $0x10] sm:$0xff]  ;;  %v938_v29 = vld [vmem:[%s2699_s4 + $0x8] sm:$0xff]  ;;  %v940_v32 = vld [vmem:[%s2699_s4 + $0x18] sm:$0xff]  ;;  %v1800_v34 = vpack.c.bf16 %v170_v27, %v169_v26 }
  0x19   :  { %1775 = vmatpush3.bf16.xpose.msk.msra.mxu1 %vm2032_vm1, %v1773_v41  ;;  %1730 = vmatprep.subr.msk.bf16.mxu0 %vm2032_vm1, %v1728_v43 }
  0x1a   :  { %1778 = vmatprep.subr.msk.bf16.mxu1 %vm2032_vm1, %v1776_v44  ;;  %953 = vperm.xlu1 %1939, %v939_v28  }
  0x20   :  { %1733 = vmatpush3.bf16.xpose.msk.msra.mxu0 %vm2032_vm1, %v1731_v54 }
  0x21   :  { %1781 = vmatpush3.bf16.xpose.msk.msra.mxu1 %vm2032_vm1, %v1779_v55  ;;  %1736 = vmatprep.subr.msk.bf16.mxu0 %vm2032_vm1, %v1734_v56 }
  0x22   :  { %1784 = vmatprep.subr.msk.bf16.mxu1 %vm2032_vm1, %v1782_v57 }
  0x28   :  { %1739 = vmatpush3.bf16.xpose.msk.msra.mxu0 %vm2032_vm1, %v1737_v2 }
  0x29   :  { %1787 = vmatpush3.bf16.xpose.msk.msra.mxu1 %vm2032_vm1, %v1785_v3  ;;  %1742 = vmatprep.subr.msk.bf16.mxu0 %vm2032_vm1, %v1740_v4 }
  0x2a   :  { %1790 = vmatprep.subr.msk.bf16.mxu1 %vm2032_vm1, %v1788_v6 }
  0x30   :  { %1745 = vmatpush3.bf16.xpose.msk.msra.mxu0 %vm2032_vm1, %v1743_v15 }
  0x31   :  { %1793 = vmatpush3.bf16.xpose.msk.msra.mxu1 %vm2032_vm1, %v1791_v16  ;;  %1748 = vmatprep.subr.msk.bf16.mxu0 %vm2032_vm1, %v1746_v17 }
  0x32   :  { %1796 = vmatprep.subr.msk.bf16.mxu1 %vm2032_vm1, %v1794_v18 }
  0x33   :  { %16 = vsyncpa [#allocation4], 0  ;;  %948 = vperm.xlu0 %1938, %v938_v29   ;;  %v1013_v35 = vld [vmem:[%s2701_s6] sm:$0xff]  ;;  %958 = vperm.xlu1 %1939, %v940_v32   ;;  %v121_v36 = vld [vmem:[%s2696_s1 + $0x70] sm:$0xff]  ;;  %vm554_vm2 = vcmask 130048   ;;  %vm1037_vm4 = vcmask 261120  }
  0x34   :  { %v122_v37 = vld [vmem:[%s2696_s1 + $0x78] sm:$0xff]  ;;  %v1014_v38 = vld [vmem:[%s2701_s6 + $0x8] sm:$0xff]  ;;  %v153_v39 = vld [vmem:[%s2696_s1 + $0x170] sm:$0xff] }
  0x35   :  { %v154_v40 = vld [vmem:[%s2696_s1 + $0x178] sm:$0xff]  ;;  %v55_v41 = vld [vmem:[%s2695_s0 + $0x80] sm:$0xff]  ;;  %v56_v42 = vld [vmem:[%s2695_s0 + $0x88] sm:$0xff]  ;;  %v1755_v46 = vpack.c.bf16 %v122_v37, %v121_v36 }
  0x36   :  { %v87_v43 = vld [vmem:[%s2695_s0 + $0x180] sm:$0xff]  ;;  %v88_v44 = vld [vmem:[%s2695_s0 + $0x188] sm:$0xff]  ;;  %v1015_v45 = vld [vmem:[%s2701_s6 + $0x10] sm:$0xff]  ;;  %v1803_v48 = vpack.c.bf16 %v154_v40, %v153_v39  ;;  %v1806_v50 = vpack.c.bf16 %v56_v42, %v55_v41 }
  0x37   :  { %1019 = vperm.xlu0 %1938, %v1013_v35   ;;  %1024 = vperm.xlu1 %1939, %v1014_v38   ;;  %v1016_v49 = vld [vmem:[%s2701_s6 + $0x18] sm:$0xff]  ;;  %v1854_v51 = vpack.c.bf16 %v88_v44, %v87_v43  ;;  %vm2326_vm3 = vmpackc.low %vm554_vm2, %vm554_vm2  ;;  %v1260_v53 = vld [vmem:[%s2702_s7] sm:$0xff] }
  0x38   :  { %1751 = vmatpush3.bf16.xpose.msk.msra.mxu0 %vm2032_vm1, %v1749_v30  ;;  %v39_v54 = vld [vmem:[%s2695_s0] sm:$0xff]  ;;  %v40_v55 = vld [vmem:[%s2695_s0 + $0x8] sm:$0xff]  ;;  %v57_v58 = vld [vmem:[%s2695_s0 + $0x90] sm:$0xff] }
  0x39   :  { %1799 = vmatpush3.bf16.xpose.msk.msra.mxu1 %vm2032_vm1, %v1797_v31  ;;  %1754 = vmatprep.subr.msk.bf16.mxu0 %vm2032_vm1, %v1752_v33  ;;  %v1261_v56 = vld [vmem:[%s2702_s7 + $0x8] sm:$0xff]  ;;  %v71_v5 = vld [vmem:[%s2695_s0 + $0x100] sm:$0xff]  ;;  %v58_v59 = vld [vmem:[%s2695_s0 + $0x98] sm:$0xff]  ;;  %v1809_v63 = vpack.c.bf16 %v40_v55, %v39_v54 }
  0x3a   :  { %1802 = vmatprep.subr.msk.bf16.mxu1 %vm2032_vm1, %v1800_v34  ;;  %v72_v57 = vld [vmem:[%s2695_s0 + $0x108] sm:$0xff]  ;;  %v89_v60 = vld [vmem:[%s2695_s0 + $0x190] sm:$0xff]  ;;  %v90_v61 = vld [vmem:[%s2695_s0 + $0x198] sm:$0xff]  ;;  %v1812_v1 = vpack.c.bf16 %v58_v59, %v57_v58 }
  0x3b   :  { %1029 = vperm.xlu0 %1938, %v1015_v45   ;;  %1034 = vperm.xlu1 %1939, %v1016_v49   ;;  %v1262_v62 = vld [vmem:[%s2702_s7 + $0x10] sm:$0xff]  ;;  %v1857_v0 = vpack.c.bf16 %v72_v57, %v71_v5  ;;  %v1860_v2 = vpack.c.bf16 %v90_v61, %v89_v60  ;;  %v42_v4 = vld [vmem:[%s2695_s0 + $0x18] sm:$0xff]  ;;  %v104_v6 = vld [vmem:[%s2698_s3 + $0x8] sm:$0xff] }
  0x3c   :  { %v41_v3 = vld [vmem:[%s2695_s0 + $0x10] sm:$0xff]  ;;  %v74_v7 = vld [vmem:[%s2695_s0 + $0x118] sm:$0xff]  ;;  %v59_v8 = vld [vmem:[%s2695_s0 + $0xa0] sm:$0xff] }
  0x3d   :  { %v60_v9 = vld [vmem:[%s2695_s0 + $0xa8] sm:$0xff]  ;;  %v91_v10 = vld [vmem:[%s2695_s0 + $0x1a0] sm:$0xff]  ;;  %v105_v11 = vld [vmem:[%s2698_s3 + $0x10] sm:$0xff]  ;;  %v1815_v15 = vpack.c.bf16 %v42_v4, %v41_v3 }
  0x3e   :  { %v92_v12 = vld [vmem:[%s2695_s0 + $0x1a8] sm:$0xff]  ;;  %v1336_v13 = vld [vmem:[#allocation2] sm:$0x1]  ;;  %v1263_v14 = vld [vmem:[%s2702_s7 + $0x18] sm:$0xff]  ;;  %v1818_v17 = vpack.c.bf16 %v60_v9, %v59_v8 }
  0x3f   :  { %1266 = vperm.xlu0 %1938, %v1260_v53   ;;  %1271 = vperm.xlu1 %1939, %v1261_v56   ;;  %v1866_v18 = vpack.c.bf16 %v92_v12, %v91_v10  ;;  %v106_v19 = vld [vmem:[%s2698_s3 + $0x18] sm:$0xff]  ;;  %v43_v20 = vld [vmem:[%s2695_s0 + $0x20] sm:$0xff]  ;;  %v44_v21 = vld [vmem:[%s2695_s0 + $0x28] sm:$0xff] }
  0x40   :  { %1757 = vmatpush3.bf16.xpose.msk.msra.mxu0 %vm2032_vm1, %v1755_v46  ;;  %v75_v22 = vld [vmem:[%s2695_s0 + $0x120] sm:$0xff]  ;;  %v76_v23 = vld [vmem:[%s2695_s0 + $0x128] sm:$0xff]  ;;  %v61_v24 = vld [vmem:[%s2695_s0 + $0xb0] sm:$0xff]  ;;  %v1821_v29 = vpack.c.bf16 %v44_v21, %v43_v20 }
  0x41   :  { %1805 = vmatpush3.bf16.xpose.msk.msra.mxu1 %vm2032_vm1, %v1803_v48  ;;  %1808 = vmatprep.subr.msk.bf16.mxu0 %vm2326_vm3, %v1806_v50  ;;  %v2453_v25 = vld [vmem:[%s2697_s2] sm:$0xff]  ;;  %v62_v26 = vld [vmem:[%s2695_s0 + $0xb8] sm:$0xff]  ;;  %v93_v27 = vld [vmem:[%s2695_s0 + $0x1b0] sm:$0xff]  ;;  %v1869_v30 = vpack.c.bf16 %v76_v23, %v75_v22 }
  0x42   :  { %1856 = vmatprep.subr.msk.bf16.mxu1 %vm2326_vm3, %v1854_v51  ;;  %v94_v28 = vld [vmem:[%s2695_s0 + $0x1b8] sm:$0xff]  ;;  %v1824_v31 = vpack.c.bf16 %v62_v26, %v61_v24  ;;  %v45_v33 = vld [vmem:[%s2695_s0 + $0x30] sm:$0xff]  ;;  %v63_v37 = vld [vmem:[%s2695_s0 + $0xc0] sm:$0xff] }
  0x43   :  { %1276 = vperm.xlu0 %1938, %v1262_v62   ;;  %1281 = vperm.xlu1 %1939, %v1263_v14   ;;  %v1872_v32 = vpack.c.bf16 %v94_v28, %v93_v27  ;;  %v46_v34 = vld [vmem:[%s2695_s0 + $0x38] sm:$0xff]  ;;  %v77_v35 = vld [vmem:[%s2695_s0 + $0x130] sm:$0xff]  ;;  %v64_v38 = vld [vmem:[%s2695_s0 + $0xc8] sm:$0xff] }
  0x44   :  { %v78_v36 = vld [vmem:[%s2695_s0 + $0x138] sm:$0xff]  ;;  %v95_v39 = vld [vmem:[%s2695_s0 + $0x1c0] sm:$0xff]  ;;  %v96_v40 = vld [vmem:[%s2695_s0 + $0x1c8] sm:$0xff]  ;;  %v1827_v41 = vpack.c.bf16 %v46_v34, %v45_v33  ;;  %v1830_v43 = vpack.c.bf16 %v64_v38, %v63_v37 }
  0x45   :  { %v1875_v42 = vpack.c.bf16 %v78_v36, %v77_v35  ;;  %v1878_v44 = vpack.c.bf16 %v96_v40, %v95_v39  ;;  %v47_v45 = vld [vmem:[%s2695_s0 + $0x40] sm:$0xff]  ;;  %v48_v46 = vld [vmem:[%s2695_s0 + $0x48] sm:$0xff]  ;;  %v65_v50 = vld [vmem:[%s2695_s0 + $0xd0] sm:$0xff] }
  0x46   :  { %v79_v48 = vld [vmem:[%s2695_s0 + $0x140] sm:$0xff]  ;;  %v80_v49 = vld [vmem:[%s2695_s0 + $0x148] sm:$0xff]  ;;  %v66_v51 = vld [vmem:[%s2695_s0 + $0xd8] sm:$0xff]  ;;  %v1833_v55 = vpack.c.bf16 %v48_v46, %v47_v45 }
  0x47   :  { %1583 = vmatmul.mubr.msk.f32.vlgmr.msra.gmra.mrb[0].mxu0 %vm171_vm0, %v2144_v47  ;;  %1339 = vperm.xlu0 %1938, %v1336_v13   ;;  %v97_v53 = vld [vmem:[%s2695_s0 + $0x1d0] sm:$0xff]  ;;  %v98_v54 = vld [vmem:[%s2695_s0 + $0x1d8] sm:$0xff]  ;;  %v1881_v56 = vpack.c.bf16 %v80_v49, %v79_v48  ;;  %v1836_v5 = vpack.c.bf16 %v66_v51, %v65_v50  ;;  %v67_v62 = vld [vmem:[%s2695_s0 + $0xe0] sm:$0xff] }
  0x48   :  { %1623 = vmatmul.mubr.msk.f32.vlgmr.msra.gmra.mrb[0].mxu1 %vm171_vm0, %v2144_v47  ;;  %1811 = vmatpush3.bf16.xpose.msk.msra.mxu0 %vm2326_vm3, %v1809_v63  ;;  %v73_v47 = vld [vmem:[%s2695_s0 + $0x110] sm:$0xff]  ;;  %v1884_v57 = vpack.c.bf16 %v98_v54, %v97_v53  ;;  %v50_v59 = vld [vmem:[%s2695_s0 + $0x58] sm:$0xff]  ;;  %v68_v63 = vld [vmem:[%s2695_s0 + $0xe8] sm:$0xff] }
  0x49   :  { %1859 = vmatpush3.bf16.xpose.msk.msra.mxu1 %vm2326_vm3, %v1857_v0  ;;  %1814 = vmatprep.subr.msk.bf16.mxu0 %vm2326_vm3, %v1812_v1  ;;  %v1863_v16 = vpack.c.bf16 %v74_v7, %v73_v47  ;;  %v49_v58 = vld [vmem:[%s2695_s0 + $0x50] sm:$0xff]  ;;  %v82_v61 = vld [vmem:[%s2695_s0 + $0x158] sm:$0xff]  ;;  %v99_v0 = vld [vmem:[%s2695_s0 + $0x1e0] sm:$0xff]  ;;  %v1842_v4 = vpack.c.bf16 %v68_v63, %v67_v62 }
  0x4a   :  { %1862 = vmatprep.subr.msk.bf16.mxu1 %vm2326_vm3, %v1860_v2  ;;  %1584 = vmatprep.mubr.msk.f32.mxu0 %vm171_vm0, %v104_v6  ;;  %v81_v60 = vld [vmem:[%s2695_s0 + $0x150] sm:$0xff]  ;;  %v100_v1 = vld [vmem:[%s2695_s0 + $0x1e8] sm:$0xff]  ;;  %v1839_v2 = vpack.c.bf16 %v50_v59, %v49_v58  ;;  %v51_v47 = vld [vmem:[%s2695_s0 + $0x60] sm:$0xff] }
  0x4b   :  { %1624 = vmatprep.mubr.msk.f32.mxu1 %vm171_vm0, %v104_v6  ;;  %1585 = vmatmul.mubr.msk.f32.gmra.mrb[2].mxu0 %vm171_vm0, %v104_v6  ;;  %v1887_v3 = vpack.c.bf16 %v82_v61, %v81_v60  ;;  %v52_v7 = vld [vmem:[%s2695_s0 + $0x68] sm:$0xff]  ;;  %v83_v8 = vld [vmem:[%s2695_s0 + $0x160] sm:$0xff]  ;;  %v69_v10 = vld [vmem:[%s2695_s0 + $0xf0] sm:$0xff] }
  0x4c   :  { %1625 = vmatmul.mubr.msk.f32.gmra.mrb[2].mxu1 %vm171_vm0, %v104_v6  ;;  %1586 = vmatprep.mubr.msk.f32.mxu0 %vm171_vm0, %v105_v11  ;;  %v1890_v6 = vpack.c.bf16 %v100_v1, %v99_v0  ;;  %v84_v9 = vld [vmem:[%s2695_s0 + $0x168] sm:$0xff]  ;;  %v101_v12 = vld [vmem:[%s2695_s0 + $0x1f0] sm:$0xff]  ;;  %v102_v13 = vld [vmem:[%s2695_s0 + $0x1f8] sm:$0xff]  ;;  %v1845_v14 = vpack.c.bf16 %v52_v7, %v51_v47 }
  0x4d   :  { %1626 = vmatprep.mubr.msk.f32.mxu1 %vm171_vm0, %v105_v11  ;;  %v85_v20 = vld [vmem:[%s2695_s0 + $0x170] sm:$0xff]  ;;  %v86_v21 = vld [vmem:[%s2695_s0 + $0x178] sm:$0xff]  ;;  %v36_v24 = vld [vmem:[%s2697_s2 + $0x8] sm:$0xff] }
  0x4e   :  { %v1899_v23 = vpack.c.bf16 %v86_v21, %v85_v20  ;;  %v37_v26 = vld [vmem:[%s2697_s2 + $0x10] sm:$0xff]  ;;  %v38_v52 = vld [vmem:[%s2697_s2 + $0x18] sm:$0xff] }
  0x4f   :  { %1587 = vmatmul.mubr.msk.f32.gmra.mrb[4].mxu0 %vm171_vm0, %v105_v11 }
  0x50   :  { %1627 = vmatmul.mubr.msk.f32.gmra.mrb[4].mxu1 %vm171_vm0, %v105_v11  ;;  %1817 = vmatpush3.bf16.xpose.msk.msra.mxu0 %vm2326_vm3, %v1815_v15  ;;  %v70_v11 = vld [vmem:[%s2695_s0 + $0xf8] sm:$0xff]  ;;  %v1893_v15 = vpack.c.bf16 %v84_v9, %v83_v8 }
  0x51   :  { %1865 = vmatpush3.bf16.xpose.msk.msra.mxu1 %vm2326_vm3, %v1863_v16  ;;  %1820 = vmatprep.subr.msk.bf16.mxu0 %vm2326_vm3, %v1818_v17  ;;  %v1848_v16 = vpack.c.bf16 %v70_v11, %v69_v10  ;;  %v1896_v17 = vpack.c.bf16 %v102_v13, %v101_v12 }
  0x52   :  { %1868 = vmatprep.subr.msk.bf16.mxu1 %vm2326_vm3, %v1866_v18  ;;  %1588 = vmatprep.mubr.msk.f32.mxu0 %vm171_vm0, %v106_v19  ;;  %v53_v18 = vld [vmem:[%s2695_s0 + $0x70] sm:$0xff] }
  0x53   :  { %1628 = vmatprep.mubr.msk.f32.mxu1 %vm171_vm0, %v106_v19  ;;  %1589 = vmatmul.mubr.msk.f32.gmra.mrb[6].mxu0 %vm171_vm0, %v106_v19 }
  0x54   :  { %1629 = vmatmul.mubr.msk.f32.gmra.mrb[6].mxu1 %vm171_vm0, %v106_v19  ;;  %1662 = vmatprep.mubr.msk.f32.mxu0 %vm554_vm2, %v2453_v25  ;;  %v54_v19 = vld [vmem:[%s2695_s0 + $0x78] sm:$0xff] }
  0x55   :  { %1702 = vmatprep.mubr.msk.f32.mxu1 %vm554_vm2, %v2453_v25  ;;  %v1851_v22 = vpack.c.bf16 %v54_v19, %v53_v18 }
  0x58   :  { %1823 = vmatpush3.bf16.xpose.msk.msra.mxu0 %vm2326_vm3, %v1821_v29 }
  0x59   :  { %1871 = vmatpush3.bf16.xpose.msk.msra.mxu1 %vm2326_vm3, %v1869_v30  ;;  %1826 = vmatprep.subr.msk.bf16.mxu0 %vm2326_vm3, %v1824_v31 }
  0x5a   :  { %1874 = vmatprep.subr.msk.bf16.mxu1 %vm2326_vm3, %v1872_v32 }
  0x60   :  { %1829 = vmatpush3.bf16.xpose.msk.msra.mxu0 %vm2326_vm3, %v1827_v41 }
  0x61   :  { %1877 = vmatpush3.bf16.xpose.msk.msra.mxu1 %vm2326_vm3, %v1875_v42  ;;  %1832 = vmatprep.subr.msk.bf16.mxu0 %vm2326_vm3, %v1830_v43 }
  0x62   :  { %1880 = vmatprep.subr.msk.bf16.mxu1 %vm2326_vm3, %v1878_v44 }
  0x68   :  { %1835 = vmatpush3.bf16.xpose.msk.msra.mxu0 %vm2326_vm3, %v1833_v55 }
  0x69   :  { %1883 = vmatpush3.bf16.xpose.msk.msra.mxu1 %vm2326_vm3, %v1881_v56  ;;  %1838 = vmatprep.subr.msk.bf16.mxu0 %vm2326_vm3, %v1836_v5 }
  0x6a   :  { %1886 = vmatprep.subr.msk.bf16.mxu1 %vm2326_vm3, %v1884_v57 }
  0x70   :  { %1841 = vmatpush3.bf16.xpose.msk.msra.mxu0 %vm2326_vm3, %v1839_v2 }
  0x71   :  { %1889 = vmatpush3.bf16.xpose.msk.msra.mxu1 %vm2326_vm3, %v1887_v3  ;;  %1844 = vmatprep.subr.msk.bf16.mxu0 %vm2326_vm3, %v1842_v4 }
  0x72   :  { %1892 = vmatprep.subr.msk.bf16.mxu1 %vm2326_vm3, %v1890_v6 }
  0x78   :  { %1847 = vmatpush3.bf16.xpose.msk.msra.mxu0 %vm2326_vm3, %v1845_v14 }
  0x79   :  { %1895 = vmatpush3.bf16.xpose.msk.msra.mxu1 %vm2326_vm3, %v1893_v15  ;;  %1850 = vmatprep.subr.msk.bf16.mxu0 %vm2326_vm3, %v1848_v16 }
  0x7a   :  { %1898 = vmatprep.subr.msk.bf16.mxu1 %vm2326_vm3, %v1896_v17 }
  0x80   :  { %1853 = vmatpush3.bf16.xpose.msk.msra.mxu0 %vm2326_vm3, %v1851_v22 }
  0x81   :  { %1901 = vmatpush3.bf16.xpose.msk.msra.mxu1 %vm2326_vm3, %v1899_v23 }
  0x87   :  { %1663 = vmatmul.mubr.msk.f32.vlgmr.msra.gmra.mrb[0].mxu0 %vm554_vm2, %v2453_v25 }
  0x88   :  { %1703 = vmatmul.mubr.msk.f32.vlgmr.msra.gmra.mrb[0].mxu1 %vm554_vm2, %v2453_v25  ;;  %1664 = vmatprep.mubr.msk.f32.mxu0 %vm554_vm2, %v36_v24  ;;  %v1965_v25 = vmov 0.0  }
  0x89   :  { %1704 = vmatprep.mubr.msk.f32.mxu1 %vm554_vm2, %v36_v24 }
  0x8b   :  { %1665 = vmatmul.mubr.msk.f32.gmra.mrb[2].mxu0 %vm554_vm2, %v36_v24 }
  0x8c   :  { %1705 = vmatmul.mubr.msk.f32.gmra.mrb[2].mxu1 %vm554_vm2, %v36_v24  ;;  %1666 = vmatprep.mubr.msk.f32.mxu0 %vm554_vm2, %v37_v26 }
  0x8d   :  { %1706 = vmatprep.mubr.msk.f32.mxu1 %vm554_vm2, %v37_v26 }
  0x8f   :  { %1667 = vmatmul.mubr.msk.f32.gmra.mrb[4].mxu0 %vm554_vm2, %v37_v26 }
  0x90   :  { %1707 = vmatmul.mubr.msk.f32.gmra.mrb[4].mxu1 %vm554_vm2, %v37_v26  ;;  %1668 = vmatprep.mubr.msk.f32.mxu0 %vm554_vm2, %v38_v52 }
  0x91   :  { %1708 = vmatprep.mubr.msk.f32.mxu1 %vm554_vm2, %v38_v52 }
  0x93   :  { %1669 = vmatmul.mubr.msk.f32.gmra.mrb[6].mxu0 %vm554_vm2, %v38_v52 }
  0x94   :  { %1709 = vmatmul.mubr.msk.f32.gmra.mrb[6].mxu1 %vm554_vm2, %v38_v52  ;;  %1114 = vmatprep.mubr.f32.mxu0 %v1965_v25 }
  0x95   :  { %1203 = vmatprep.mubr.f32.mxu1 %v1965_v25 }
  0x97   :  { %v944_v27 = vpop.permute.xlu0 %943 }
  0x99   :  { %v954_v37 = vpop.permute.xlu1 %953 }
  0xb2   :  { %v949_v36 = vpop.permute.xlu0 %948  ;;  %v959_v7 = vpop.permute.xlu1 %958 }
 0x15a   :  { %v825_v28 = vpop.f32.mrb[0].mxu0 }
 0x15b   :  { %v914_v29 = vpop.f32.mrb[0].mxu1  ;;  %v961_v30 = vadd.f32 %v944_v27, %v825_v28  ;;  %v827_v32 = vpop.f32.mrb[1].mxu0 }
 0x15c   :  { %v963_v31 = vadd.f32 %v944_v27, %v914_v29  ;;  %v916_v33 = vpop.f32.mrb[1].mxu1  ;;  %v962_v34 = vadd.f32 %v944_v27, %v827_v32 }
 0x15d   :  { %v964_v35 = vadd.f32 %v944_v27, %v916_v33  ;;  %v977_v38 = vmul.f32 0.2, %v961_v30 }
 0x15e   :  { %v979_v39 = vmul.f32 0.2, %v963_v31  ;;  %v978_v40 = vmul.f32 0.2, %v962_v34  ;;  %v831_v42 = vpop.f32.mrb[2].mxu0 }
 0x15f   :  { %v980_v41 = vmul.f32 0.2, %v964_v35  ;;  %v920_v43 = vpop.f32.mrb[2].mxu1  ;;  %v965_v44 = vadd.f32 %v949_v36, %v831_v42  ;;  %v833_v46 = vpop.f32.mrb[3].mxu0  ;;  %v993_v51 = vmax.f32 %v961_v30, %v977_v38  ;;  %v1011_v42 = vld [vmem:[%s2700_s5 + $0x10] sm:$0xff] }
 0x160   :  { %v967_v45 = vadd.f32 %v949_v36, %v920_v43  ;;  %v922_v48 = vpop.f32.mrb[3].mxu1  ;;  %v966_v49 = vadd.f32 %v949_v36, %v833_v46  ;;  %v995_v53 = vmax.f32 %v963_v31, %v979_v39  ;;  %v994_v56 = vmax.f32 %v962_v34, %v978_v40  ;;  %v1009_v40 = vld [vmem:[%s2700_s5] sm:$0xff]  ;;  %v1012_v43 = vld [vmem:[%s2700_s5 + $0x18] sm:$0xff] }
 0x161   :  { %v968_v50 = vadd.f32 %v949_v36, %v922_v48  ;;  %v981_v54 = vmul.f32 0.2, %v965_v44  ;;  %v996_v5 = vmax.f32 %v964_v35, %v980_v41  ;;  %v1010_v41 = vld [vmem:[%s2700_s5 + $0x8] sm:$0xff]  ;;  %s1967_s5 = smov [#allocation3]  }
 0x162   :  { %v983_v55 = vmul.f32 0.2, %v967_v45  ;;  %v982_v57 = vmul.f32 0.2, %v966_v49  ;;  %v837_v59 = vpop.f32.mrb[4].mxu0  ;;  %s1390_s21 = sshll.u32 %s1967_s5, 4  ;;  %s1391_s21 = int_to_ptr.vmem [resolvable:$true] %s1390_s21 }
 0x163   :  { %v984_v58 = vmul.f32 0.2, %v968_v50  ;;  %v926_v60 = vpop.f32.mrb[4].mxu1  ;;  %v997_v61 = vmax.f32 %v965_v44, %v981_v54  ;;  %v969_v63 = vadd.f32 %v954_v37, %v837_v59  ;;  %v839_v1 = vpop.f32.mrb[5].mxu0  ;;  %s1940_s22 = scalar_lea.vmem %s1391_s21, 64  ;;  %p1945_p1 = scmp.lt.s32.totalorder %s1391_s21, %s1391_s21 }
 0x164   :  { %v999_v62 = vmax.f32 %v967_v45, %v983_v55  ;;  %v971_v0 = vadd.f32 %v954_v37, %v926_v60  ;;  %v928_v2 = vpop.f32.mrb[5].mxu1  ;;  %v998_v3 = vmax.f32 %v966_v49, %v982_v57  ;;  %v970_v6 = vadd.f32 %v954_v37, %v839_v1  ;;  %v1020_v44 = vpop.permute.xlu0 %1019  ;;  %p1941_p0 = scmp.ne.s32.totalorder %s1391_s21, %s1940_s22  ;;  %p1946_p2 = scmp.lt.s32.totalorder %s1940_s22, %s1940_s22 }
 0x165   :  { %v1000_v4 = vmax.f32 %v968_v50, %v984_v58  ;;  %v972_v47 = vadd.f32 %v954_v37, %v928_v2  ;;  %v1904_v8 = vpack.c.bf16 %v997_v61, %v993_v51  ;;  %v985_v14 = vmul.f32 0.2, %v969_v63  ;;  %v1025_v45 = vpop.permute.xlu1 %1024 }
 0x166   :  { %v1912_v9 = vpack.c.bf16 %v999_v62, %v995_v53  ;;  %v843_v10 = vpop.f32.mrb[6].mxu0  ;;  %v1902_v12 = vpack.c.bf16 %v998_v3, %v994_v56  ;;  %v987_v15 = vmul.f32 0.2, %v971_v0  ;;  %v986_v20 = vmul.f32 0.2, %v970_v6  ;;  %p1947_p3 = por %p1946_p2, %p1945_p1 }
 0x167   :  { %v932_v11 = vpop.f32.mrb[6].mxu1  ;;  %v1910_v13 = vpack.c.bf16 %v1000_v4, %v996_v5  ;;  %v973_v16 = vadd.f32 %v959_v7, %v843_v10  ;;  %v845_v18 = vpop.f32.mrb[7].mxu0  ;;  %v988_v21 = vmul.f32 0.2, %v972_v47  ;;  %v1001_v28 = vmax.f32 %v969_v63, %v985_v14 }
 0x168   :  { %v975_v17 = vadd.f32 %v959_v7, %v932_v11  ;;  %v934_v19 = vpop.f32.mrb[7].mxu1  ;;  %v974_v22 = vadd.f32 %v959_v7, %v845_v18  ;;  %1903 = vmatprep.subr.bf16.mxu0 %v1902_v12  ;;  %v1003_v29 = vmax.f32 %v971_v0, %v987_v15  ;;  %v1002_v32 = vmax.f32 %v970_v6, %v986_v20  ;;  %v1030_v46 = vpop.permute.xlu0 %1029  ;;  %p1948_p4 = pnand %p1947_p3, %p1941_p0 }
 0x169   :  { %v976_v23 = vadd.f32 %v959_v7, %v934_v19  ;;  %v989_v24 = vmul.f32 0.2, %v973_v16  ;;  %1911 = vmatprep.subr.bf16.mxu1 %v1910_v13  ;;  %1905 = vmatpush1.bf16.msra.mxu0 %v1904_v8  ;;  %v1004_v33 = vmax.f32 %v972_v47, %v988_v21 }
 0x16a   :  { %v991_v26 = vmul.f32 0.2, %v975_v17  ;;  %v990_v52 = vmul.f32 0.2, %v974_v22  ;;  %1913 = vmatpush1.bf16.msra.mxu1 %v1912_v9 }
 0x16b   :  { %v992_v27 = vmul.f32 0.2, %v976_v23  ;;  %v1005_v30 = vmax.f32 %v973_v16, %v989_v24 }
 0x16c   :  { %v1007_v31 = vmax.f32 %v975_v17, %v991_v26  ;;  %v1006_v34 = vmax.f32 %v974_v22, %v990_v52  ;;  %v1267_v4 = vpop.permute.xlu0 %1266 }
 0x16d   :  { %v1008_v35 = vmax.f32 %v976_v23, %v992_v27  ;;  %v1908_v36 = vpack.c.bf16 %v1005_v30, %v1001_v28 }
 0x16e   :  { %v1916_v37 = vpack.c.bf16 %v1007_v31, %v1003_v29  ;;  %v1906_v38 = vpack.c.bf16 %v1006_v34, %v1002_v32 }
 0x16f   :  { %v1914_v39 = vpack.c.bf16 %v1008_v35, %v1004_v33 }
 0x170   :  { %1907 = vmatprep.subr.bf16.mxu0 %v1906_v38 }
 0x171   :  { %1915 = vmatprep.subr.bf16.mxu1 %v1914_v39  ;;  %1909 = vmatpush1.bf16.msra.mxu0 %v1908_v36 }
 0x172   :  { %1917 = vmatpush1.bf16.msra.mxu1 %v1916_v37 }
 0x174   :  { %1542 = vmatmul.mubr.msk.f32.vlgmr.msra.gmra.mrb[8].mxu0 %vm1037_vm4, %v1009_v40 }
 0x175   :  { %1546 = vmatmul.mubr.msk.f32.vlgmr.msra.gmra.mrb[8].mxu1 %vm1037_vm4, %v1009_v40  ;;  %1120 = vmatprep.mubr.f32.mxu0 %v1965_v25 }
 0x176   :  { %1209 = vmatprep.mubr.f32.mxu1 %v1965_v25 }
 0x178   :  { %1543 = vmatmul.mubr.msk.f32.gmra.mrb[10].mxu0 %vm1037_vm4, %v1010_v41 }
 0x179   :  { %1547 = vmatmul.mubr.msk.f32.gmra.mrb[10].mxu1 %vm1037_vm4, %v1010_v41  ;;  %1126 = vmatprep.mubr.f32.mxu0 %v1965_v25 }
 0x17a   :  { %1215 = vmatprep.mubr.f32.mxu1 %v1965_v25 }
 0x17c   :  { %1544 = vmatmul.mubr.msk.f32.gmra.mrb[12].mxu0 %vm1037_vm4, %v1011_v42 }
 0x17d   :  { %1548 = vmatmul.mubr.msk.f32.gmra.mrb[12].mxu1 %vm1037_vm4, %v1011_v42  ;;  %1132 = vmatprep.mubr.f32.mxu0 %v1965_v25 }
 0x17e   :  { %1221 = vmatprep.mubr.f32.mxu1 %v1965_v25  ;;  %v2677_v25 = vpop.permute.xlu1 %1034 }
 0x180   :  { %1545 = vmatmul.mubr.msk.f32.gmra.mrb[14].mxu0 %vm1037_vm4, %v1012_v43 }
 0x181   :  { %1549 = vmatmul.mubr.msk.f32.gmra.mrb[14].mxu1 %vm1037_vm4, %v1012_v43 }
 0x182   :  { %v1272_v26 = vpop.permute.xlu1 %1271 }
 0x247   :  { %v1116_v48 = vpop.f32.mrb[8].mxu0 }
 0x248   :  { %v1205_v49 = vpop.f32.mrb[8].mxu1  ;;  %v1117_v50 = vadd.f32 %v1116_v48, %v1020_v44  ;;  %v1118_v53 = vpop.f32.mrb[9].mxu0 }
 0x249   :  { %v1206_v51 = vadd.f32 %v1205_v49, %v1020_v44  ;;  %v1207_v54 = vpop.f32.mrb[9].mxu1  ;;  %v1119_v55 = vadd.f32 %v1118_v53, %v1020_v44  ;;  %v1277_v48 = vpop.permute.xlu0 %1276 }
 0x24a   :  { %v1208_v56 = vadd.f32 %v1207_v54, %v1020_v44  ;;  %v1228_v5 = vmul.f32 0.2, %v1117_v50 }
 0x24b   :  { %v1230_v57 = vmul.f32 0.2, %v1206_v51  ;;  %v1229_v58 = vmul.f32 0.2, %v1119_v55  ;;  %v1122_v60 = vpop.f32.mrb[10].mxu0 }
 0x24c   :  { %v1231_v59 = vmul.f32 0.2, %v1208_v56  ;;  %v1211_v61 = vpop.f32.mrb[10].mxu1  ;;  %v1244_v62 = vmax.f32 %v1117_v50, %v1228_v5  ;;  %v1123_v0 = vadd.f32 %v1122_v60, %v1025_v45  ;;  %v1124_v2 = vpop.f32.mrb[11].mxu0 }
 0x24d   :  { %v1246_v63 = vmax.f32 %v1206_v51, %v1230_v57  ;;  %v1212_v1 = vadd.f32 %v1211_v61, %v1025_v45  ;;  %v1213_v3 = vpop.f32.mrb[11].mxu1  ;;  %v1245_v6 = vmax.f32 %v1119_v55, %v1229_v58  ;;  %v1125_v7 = vadd.f32 %v1124_v2, %v1025_v45 }
 0x24e   :  { %v1247_v47 = vmax.f32 %v1208_v56, %v1231_v59  ;;  %v1214_v8 = vadd.f32 %v1213_v3, %v1025_v45  ;;  %v1284_v9 = vmul.f32 %v1267_v4, %v1244_v62  ;;  %v1232_v11 = vmul.f32 0.2, %v1123_v0 }
 0x24f   :  { %v1286_v10 = vmul.f32 %v1267_v4, %v1246_v63  ;;  %v1234_v12 = vmul.f32 0.2, %v1212_v1  ;;  %v1285_v13 = vmul.f32 %v1267_v4, %v1245_v6  ;;  %v1233_v15 = vmul.f32 0.2, %v1125_v7  ;;  %v1128_v17 = vpop.f32.mrb[12].mxu0 }
 0x250   :  { %v1287_v14 = vmul.f32 %v1267_v4, %v1247_v47  ;;  %v1235_v16 = vmul.f32 0.2, %v1214_v8  ;;  %v1217_v18 = vpop.f32.mrb[12].mxu1  ;;  %v1248_v19 = vmax.f32 %v1123_v0, %v1232_v11  ;;  %v1129_v21 = vadd.f32 %v1128_v17, %v1030_v46  ;;  %v1130_v23 = vpop.f32.mrb[13].mxu0 }
 0x251   :  { %v1250_v20 = vmax.f32 %v1212_v1, %v1234_v12  ;;  %v1218_v22 = vadd.f32 %v1217_v18, %v1030_v46  ;;  %v1219_v24 = vpop.f32.mrb[13].mxu1  ;;  %v1249_v52 = vmax.f32 %v1125_v7, %v1233_v15  ;;  %v1131_v28 = vadd.f32 %v1130_v23, %v1030_v46  ;;  %v1282_v47 = vpop.permute.xlu1 %1281 }
 0x252   :  { %v1251_v27 = vmax.f32 %v1214_v8, %v1235_v16  ;;  %v1220_v29 = vadd.f32 %v1219_v24, %v1030_v46  ;;  %v1288_v30 = vmul.f32 %v1272_v26, %v1248_v19  ;;  %v1236_v32 = vmul.f32 0.2, %v1129_v21 }
 0x253   :  { %v1290_v31 = vmul.f32 %v1272_v26, %v1250_v20  ;;  %v1238_v33 = vmul.f32 0.2, %v1218_v22  ;;  %v1289_v34 = vmul.f32 %v1272_v26, %v1249_v52  ;;  %v1237_v36 = vmul.f32 0.2, %v1131_v28  ;;  %v1134_v38 = vpop.f32.mrb[14].mxu0 }
 0x254   :  { %v1291_v35 = vmul.f32 %v1272_v26, %v1251_v27  ;;  %v1239_v37 = vmul.f32 0.2, %v1220_v29  ;;  %v1223_v39 = vpop.f32.mrb[14].mxu1  ;;  %v1300_v40 = vadd.f32 %v1288_v30, %v1284_v9  ;;  %v1252_v42 = vmax.f32 %v1129_v21, %v1236_v32  ;;  %v1136_v44 = vpop.f32.mrb[15].mxu0 }
 0x255   :  { %v1318_v41 = vadd.f32 %v1290_v31, %v1286_v10  ;;  %v1254_v43 = vmax.f32 %v1218_v22, %v1238_v33  ;;  %v1225_v45 = vpop.f32.mrb[15].mxu1  ;;  %v1309_v49 = vadd.f32 %v1289_v34, %v1285_v13  ;;  %v1253_v46 = vmax.f32 %v1131_v28, %v1237_v36 }
 0x256   :  { %v1327_v50 = vadd.f32 %v1291_v35, %v1287_v14  ;;  %v1255_v51 = vmax.f32 %v1220_v29, %v1239_v37  ;;  %v1292_v53 = vmul.f32 %v1277_v48, %v1252_v42  ;;  %v1135_v55 = vadd.f32 %v1134_v38, %v2677_v25  ;;  %v1340_v35 = vpop.permute.xlu0 %1339 }
 0x257   :  { %v1294_v54 = vmul.f32 %v1277_v48, %v1254_v43  ;;  %v1224_v56 = vadd.f32 %v1223_v39, %v2677_v25  ;;  %v1293_v5 = vmul.f32 %v1277_v48, %v1253_v46  ;;  %v1137_v58 = vadd.f32 %v1136_v44, %v2677_v25 }
 0x258   :  { %v1295_v57 = vmul.f32 %v1277_v48, %v1255_v51  ;;  %v1226_v59 = vadd.f32 %v1225_v45, %v2677_v25  ;;  %v1301_v60 = vadd.f32 %v1300_v40, %v1292_v53  ;;  %v1240_v62 = vmul.f32 0.2, %v1135_v55 }
 0x259   :  { %v1319_v61 = vadd.f32 %v1318_v41, %v1294_v54  ;;  %v1242_v63 = vmul.f32 0.2, %v1224_v56  ;;  %v1310_v0 = vadd.f32 %v1309_v49, %v1293_v5  ;;  %v1241_v2 = vmul.f32 0.2, %v1137_v58 }
 0x25a   :  { %v1328_v1 = vadd.f32 %v1327_v50, %v1295_v57  ;;  %v1243_v3 = vmul.f32 0.2, %v1226_v59  ;;  %v1256_v4 = vmax.f32 %v1135_v55, %v1240_v62  ;;  %v1342_v13 = vlaneseq }
 0x25b   :  { %v1258_v6 = vmax.f32 %v1224_v56, %v1242_v63  ;;  %v1257_v7 = vmax.f32 %v1137_v58, %v1241_v2  ;;  %v1966_v28 = vmov 1966171168  }
 0x25c   :  { %v1259_v8 = vmax.f32 %v1226_v59, %v1243_v3  ;;  %v1296_v9 = vmul.f32 %v1282_v47, %v1256_v4  ;;  %v1343_v21 = vshrl.u32 %v1342_v13, 7  ;;  %v1357_v29 = vunpack.c.l.s4 %v1966_v28 }
 0x25d   :  { %v1298_v10 = vmul.f32 %v1282_v47, %v1258_v6  ;;  %v1297_v11 = vmul.f32 %v1282_v47, %v1257_v7  ;;  %vm1381_vm5 = vcmp.lt.s32.totalorder %v1342_v13, 512 }
 0x25e   :  { %v1299_v12 = vmul.f32 %v1282_v47, %v1259_v8  ;;  %v1302_v14 = vadd.f32 %v1301_v60, %v1296_v9  ;;  %v1344_v32 = vsub.s32 0, %v1343_v21  ;;  %v1358_v40 = vunpack.c.0.s8 %v1357_v29 }
 0x25f   :  { %v1320_v25 = vadd.f32 %v1319_v61, %v1298_v10  ;;  %v1311_v15 = vadd.f32 %v1310_v0, %v1297_v11 }
 0x260   :  { %v1329_v16 = vadd.f32 %v1328_v1, %v1299_v12  ;;  %v1303_v17 = vrot.slane %v1302_v14, 4  ;;  %v1345_v43 = vrot.slane %v1340_v35, %v1344_v32  ;;  %v1361_v51 = vsub.s32 %v1358_v40, %v1343_v21 }
 0x261   :  { %v1321_v18 = vrot.slane %v1320_v25, 4  ;;  %v1312_v19 = vrot.slane %v1311_v15, 4 }
 0x262   :  { %v1330_v20 = vrot.slane %v1329_v16, 4  ;;  %v1304_v22 = vadd.f32 %v1303_v17, %v1302_v14 }
 0x263   :  { %v1322_v23 = vadd.f32 %v1321_v18, %v1320_v25  ;;  %v1313_v24 = vadd.f32 %v1312_v19, %v1311_v15 }
 0x264   :  { %v1331_v26 = vadd.f32 %v1330_v20, %v1329_v16  ;;  %v1305_v52 = vrot.slane %v1304_v22, 2 }
 0x265   :  { %v1323_v27 = vrot.slane %v1322_v23, 2  ;;  %v1314_v30 = vrot.slane %v1313_v24, 2 }
 0x266   :  { %v1332_v31 = vrot.slane %v1331_v26, 2  ;;  %v1306_v33 = vadd.f32 %v1305_v52, %v1304_v22 }
 0x267   :  { %v1324_v34 = vadd.f32 %v1323_v27, %v1322_v23  ;;  %v1315_v36 = vadd.f32 %v1314_v30, %v1313_v24 }
 0x268   :  { %v1333_v37 = vadd.f32 %v1332_v31, %v1331_v26  ;;  %v1307_v38 = vrot.slane %v1306_v33, 1 }
 0x269   :  { %v1325_v39 = vrot.slane %v1324_v34, 1  ;;  %v1316_v41 = vrot.slane %v1315_v36, 1 }
 0x26a   :  { %v1334_v42 = vrot.slane %v1333_v37, 1  ;;  %v1308_v44 = vadd.f32 %v1307_v38, %v1306_v33 }
 0x26b   :  { %v1326_v45 = vadd.f32 %v1325_v39, %v1324_v34  ;;  %v1317_v48 = vadd.f32 %v1316_v41, %v1315_v36 }
 0x26c   :  { %v1335_v49 = vadd.f32 %v1334_v42, %v1333_v37  ;;  %v1346_v50 = vadd.f32 %v1345_v43, %v1308_v44 }
 0x26d   :  { %v1348_v46 = vadd.f32 %v1345_v43, %v1326_v45  ;;  %v1347_v53 = vadd.f32 %v1345_v43, %v1317_v48 }
 0x26e   :  { %v1349_v54 = vadd.f32 %v1345_v43, %v1335_v49 }
 0x26f   :  { %v1354_v55 = vcombine.low %v1346_v50, %v1347_v53 }
 0x270   :  { %v1355_v56 = vcombine.low %v1348_v46, %v1349_v54 }
 0x271   :  { %v1362_v5 = vrot.slane %v1354_v55, %v1361_v51 }
 0x272   :  { %v1369_v57 = vrot.slane %v1355_v56, %v1361_v51 }
 0x274   :  { %v1370_v58 = vcombine.low %v1362_v5, %v1369_v57 }
 0x276   :  { %v1377_v59 = vrot.slane %v1370_v58, %v1361_v51 }
 0x278   :  { %1383 = vst.msk [vmem:[#allocation3] sm:$0xf] %vm1381_vm5, %v1377_v59 }
 0x279   :  { %1951 = shalt.err (!%p1948_p4)
}
 0x27a   :  { %s1952_s25 = scalar_lea.hbm %s2704_s9, 64 }
 0x27b   :  { %p1953_p5 = scmp.ne.s32.totalorder %s2704_s9, %s1952_s25  ;;  %p1956_p6 = scmp.lt.u32.totalorder %s1952_s25, %s2704_s9 }
 0x27d   :  { %p1958_p7 = pnand %p1956_p6, %p1953_p5 }
 0x27f   :  { %1961 = shalt.err (!%p1958_p7)
}
 0x280   :  { %1393 = dma.vmem_to_hbm [thread:$0]  %s1391_s21, 64, %s2704_s9, [#allocation4]  }
 0x281   :  { %1962 = dma.done.wait [#allocation4], 64  }
 0x282   :  { %1963 = vsyncadd [#allocation4], 4294967232 }
 0x283   :  { %1397 = vsyncpa [#allocation4], 1 }

</bundles_post_ra>
